<compile_context>
chip_gen: v7x
topology: tpu7x:2x2x1
jax: 0.10.0
libtpu: 0.0.40
codegen_flags: <defaults>
</compile_context>

<pallas_src>
import math
import functools

import jax
import jax.numpy as jnp
from jax.experimental import pallas as pl
from jax.experimental.pallas import tpu as pltpu


def _sparse_intermediate_kernel(x_ref, w_ref, b_ref, o_ref, *, th, tn):
    j = pl.program_id(0)
    # x is resident (constant block index); cast to bf16 so the matmul takes the
    # native bf16 MXU path.  Accumulation stays f32.
    xb = x_ref[...].astype(jnp.bfloat16)
    h = jnp.dot(xb, w_ref[0], preferred_element_type=jnp.float32)   # (tm, tn) f32
    # bias is fully resident as (1, N); slice this tile's (1, tn) window.
    start = pl.multiple_of(j * tn, 128)
    h = h + b_ref[:, pl.ds(start, tn)]
    # exact GeLU (matches torch.nn.functional.gelu default: erf formulation)
    g = 0.5 * h * (1.0 + jax.lax.erf(h * (1.0 / math.sqrt(2.0))))
    # activation_sparse: zero out entries with |g| <= Th
    g = jnp.where(jnp.abs(g) > th, g, 0.0)
    o_ref[...] = g.astype(o_ref.dtype)


def sparse_intermediate(x, weight_t, bias, th, *, tn=1536):
    """x: (B, S, 768) f32; weight_t: (768, 3072) f32 (nn.Linear weight transposed to
    (in, out)); bias: (3072,) f32."""
    B, S, K = x.shape
    N = weight_t.shape[1]
    M = B * S
    assert M % 8 == 0, "B*S must be a multiple of 8 (f32 sublane tile)"
    assert N % tn == 0 and tn % 128 == 0, "tn must divide N and be a multiple of 128"

    x2d = x.reshape(M, K)
    bias2d = bias.astype(jnp.float32).reshape(1, N)

    # One-time weight prep (in real usage cache this across calls):
    #  * bf16 halves the bytes streamed from HBM (the kernel's only real cost),
    #  * re-tiling to (N//tn, K, tn) makes each grid step's W tile one contiguous
    #    HBM slab, keeping DMA bursts long at the 2-byte dtype.
    # TODO(synk): for even lower bandwidth, int8/fp8 W with a per-column scale folded
    # into the epilogue is possible but needs mask-agreement validation vs f32.
    w_tiles = (
        weight_t.astype(jnp.bfloat16)
        .reshape(K, N // tn, tn)
        .transpose(1, 0, 2)
    )  # (N//tn, K, tn); w_tiles[j] == weight_t[:, j*tn:(j+1)*tn]

    kernel = functools.partial(_sparse_intermediate_kernel, th=float(th), tn=tn)

    bytes_accessed = (
        x2d.size * x2d.dtype.itemsize
        + w_tiles.size * w_tiles.dtype.itemsize
        + bias2d.size * bias2d.dtype.itemsize
        + M * N * jnp.dtype(x.dtype).itemsize
    )
    cost = pl.CostEstimate(
        flops=2 * M * K * N,
        transcendentals=M * N,            # one erf per output element
        bytes_accessed=bytes_accessed,
    )

    out2d = pl.pallas_call(
        kernel,
        out_shape=jax.ShapeDtypeStruct((M, N), x.dtype),
        grid_spec=pltpu.PrefetchScalarGridSpec(
            num_scalar_prefetch=0,
            grid=(N // tn,),                                     # 1-D grid over N
            in_specs=[
                pl.BlockSpec((M, K), lambda j: (0, 0)),          # x: resident
                pl.BlockSpec((1, K, tn), lambda j: (j, 0, 0)),   # W: streamed, contiguous tiles
                pl.BlockSpec((1, N), lambda j: (0, 0)),          # bias: resident
            ],
            out_specs=pl.BlockSpec((M, tn), lambda j: (0, j)),
        ),
        compiler_params=pltpu.CompilerParams(
            dimension_semantics=("parallel",),
        ),
        cost_estimate=cost,
    )(x2d, w_tiles, bias2d)

    return out2d.reshape(B, S, N)


if __name__ == "__main__":
    B, S, K, N = 2, 8, 768, 3072
    Th = 0.1

    key = jax.random.PRNGKey(0)
    kx, kw, kb = jax.random.split(key, 3)

    x = jax.random.normal(kx, (B, S, K), dtype=jnp.float32)
    # deterministic "Linear(768, 3072)" params (W stored transposed: (in, out))
    weight_t = jax.random.normal(kw, (K, N), dtype=jnp.float32) * 0.02
    bias = jax.random.normal(kb, (N,), dtype=jnp.float32) * 0.02

    out = sparse_intermediate(x, weight_t, bias, Th)
    out = jax.block_until_ready(out)

    # Pure-JAX reference mirroring the kernel's bf16-weight / f32-accumulate path.
    xb = x.reshape(-1, K).astype(jnp.bfloat16)
    wb = weight_t.astype(jnp.bfloat16)
    h = jnp.dot(xb, wb, preferred_element_type=jnp.float32) + bias
    g = 0.5 * h * (1.0 + jax.lax.erf(h / math.sqrt(2.0)))
    ref = jnp.where(jnp.abs(g) > Th, g, 0.0)

    out2d = out.reshape(-1, N)
    close = jnp.abs(out2d - ref) <= (1e-3 + 1e-3 * jnp.abs(ref))
    # Elements with |g| within a hair of Th may legitimately flip the sparsity mask
    # between two valid f32 accumulation orders; exclude that band from the check.
    near_th = jnp.abs(jnp.abs(g) - Th) < 1e-3
    assert bool(jnp.all(close | near_th)), "mismatch vs reference"

    print("KERNEL_OK")
</pallas_src>

<mosaic_0001>
module attributes {stable_mosaic.version = 11 : i64} {
  func.func @_sparse_intermediate_kernel(%arg0: i32, %arg1: memref<16x768xf32, #tpu.memory_space<vmem>>, %arg2: memref<1x768x1536xbf16, #tpu.memory_space<vmem>>, %arg3: memref<1x3072xf32, #tpu.memory_space<vmem>>, %arg4: memref<16x1536xf32, #tpu.memory_space<vmem>>) attributes {dimension_semantics = [#tpu.dimension_semantics<parallel>], iteration_bounds = array<i64: 2>, scalar_prefetch = 0 : i64, scratch_operands = 0 : i64, tpu.core_type = #tpu.core_type<tc>, window_params = [{pipeline_mode = #tpu.pipeline_mode<synchronous>, transform_indices = @transform_0, window_bounds = array<i64: 16, 768>}, {transform_indices = @transform_1, window_bounds = array<i64: 1, 768, 1536>}, {pipeline_mode = #tpu.pipeline_mode<synchronous>, transform_indices = @transform_2, window_bounds = array<i64: 1, 3072>}, {transform_indices = @transform_3, window_bounds = array<i64: 16, 1536>}]} {
    %c0 = arith.constant 0 : index
    %c0_0 = arith.constant 0 : index
    %0 = vector.load %arg1[%c0, %c0_0] : memref<16x768xf32, #tpu.memory_space<vmem>>, vector<16x768xf32>
    %1 = arith.truncf %0 : vector<16x768xf32> to vector<16x768xbf16>
    %c0_1 = arith.constant 0 : index
    %c0_2 = arith.constant 0 : index
    %c0_3 = arith.constant 0 : index
    %2 = vector.load %arg2[%c0_1, %c0_2, %c0_3] : memref<1x768x1536xbf16, #tpu.memory_space<vmem>>, vector<1x768x1536xbf16>
    %3 = vector.shape_cast %2 : vector<1x768x1536xbf16> to vector<768x1536xbf16>
    %cst = arith.constant dense<0.000000e+00> : vector<16x1536xf32>
    %4 = tpu.matmul %1, %3, %cst {dimension_numbers = #tpu.dot_dimension_numbers<[1], [0], [0], [1], [0, 0, 1, 1], [], []>} : vector<16x768xbf16>, vector<768x1536xbf16>, vector<16x1536xf32> -> vector<16x1536xf32>
    %c1536_i32 = arith.constant 1536 : i32
    %5 = arith.muli %arg0, %c1536_i32 : i32
    %6 = tpu.assume_multiple %5, 128 : i32
    %c0_4 = arith.constant 0 : index
    %7 = arith.index_cast %6 : i32 to index
    %8 = vector.load %arg3[%c0_4, %7] : memref<1x3072xf32, #tpu.memory_space<vmem>>, vector<1x1536xf32>
    %9 = vector.broadcast %8 : vector<1x1536xf32> to vector<16x1536xf32>
    %10 = arith.addf %4, %9 : vector<16x1536xf32>
    %cst_5 = arith.constant 5.000000e-01 : f32
    %11 = vector.broadcast %cst_5 : f32 to vector<16x1536xf32>
    %12 = arith.mulf %11, %10 : vector<16x1536xf32>
    %cst_6 = arith.constant 0.707106769 : f32
    %13 = vector.broadcast %cst_6 : f32 to vector<16x1536xf32>
    %14 = arith.mulf %10, %13 : vector<16x1536xf32>
    %15 = math.erf %14 : vector<16x1536xf32>
    %cst_7 = arith.constant 1.000000e+00 : f32
    %16 = vector.broadcast %cst_7 : f32 to vector<16x1536xf32>
    %17 = arith.addf %16, %15 : vector<16x1536xf32>
    %18 = arith.mulf %12, %17 : vector<16x1536xf32>
    %19 = math.absf %18 : vector<16x1536xf32>
    %cst_8 = arith.constant 1.000000e-01 : f32
    %20 = vector.broadcast %cst_8 : f32 to vector<16x1536xf32>
    %21 = arith.cmpf ogt, %19, %20 : vector<16x1536xf32>
    %cst_9 = arith.constant 0.000000e+00 : f32
    %22 = vector.broadcast %cst_9 : f32 to vector<16x1536xf32>
    %23 = arith.select %21, %18, %22 : vector<16x1536xi1>, vector<16x1536xf32>
    %c0_10 = arith.constant 0 : index
    %c0_11 = arith.constant 0 : index
    %24 = vector.load %arg4[%c0_10, %c0_11] : memref<16x1536xf32, #tpu.memory_space<vmem>>, vector<16x1536xf32>
    tpu.vector_store %arg4[%c0_10, %c0_11], %23 {strides = array<i32>} : memref<16x1536xf32, #tpu.memory_space<vmem>>, vector<16x1536xf32>,
    return
  }
  func.func @transform_0(%arg0: i32) -> (i32, i32) {
    %c0_i32 = arith.constant 0 : i32
    %c0_i32_0 = arith.constant 0 : i32
    %c0_i32_1 = arith.constant 0 : i32
    return %c0_i32, %c0_i32_0 : i32, i32
  }
  func.func @transform_1(%arg0: i32) -> (i32, i32, i32) {
    %c0_i32 = arith.constant 0 : i32
    %c0_i32_0 = arith.constant 0 : i32
    %c0_i32_1 = arith.constant 0 : i32
    return %arg0, %c0_i32, %c0_i32_0 : i32, i32, i32
  }
  func.func @transform_2(%arg0: i32) -> (i32, i32) {
    %c0_i32 = arith.constant 0 : i32
    %c0_i32_0 = arith.constant 0 : i32
    %c0_i32_1 = arith.constant 0 : i32
    return %c0_i32, %c0_i32_0 : i32, i32
  }
  func.func @transform_3(%arg0: i32) -> (i32, i32) {
    %c0_i32 = arith.constant 0 : i32
    %c0_i32_0 = arith.constant 0 : i32
    return %c0_i32, %arg0 : i32, i32
  }
}

</mosaic_0001>

<bundles_post_ra>
// kernel: tpu_custom_call.1
= control target key start
LH: loop header
LB: loop body
LE: loop exit
PB: predicated region body
PF: predicated region fallthrough
CT: control target
= control target key end

     0   :  { %8 = vsyncpa [#allocation3], 0  ;;  %s7667_s0 = inlined_call_operand.hbm [shape: f32[16,768], index: 0, kind: input, shape index: {}]   ;;  %s7668_s1 = inlined_call_operand.hbm [shape: bf16[2,768,1536], index: 1, kind: input, shape index: {}]   ;;  %s7669_s2 = inlined_call_operand.hbm [shape: f32[1,3072], index: 2, kind: input, shape index: {}]   ;;  %s7670_s3 = inlined_call_operand.hbm [shape: f32[16,3072], index: 3, kind: output, shape index: {}]  }
   0x1   :  { %9 = vsyncpa [#allocation6], 0 }
   0x2   :  { %11 = vsyncpa [#allocation6 + $0x1], 0 }
   0x3   :  { %12 = vsyncpa [#allocation4], 0 }
   0x4   :  { %14 = vsyncpa [#allocation4 + $0x1], 0  ;;  %s6698_s12 = smov 0   ;;  %s6700_s13 = smov 0  }
   0x5   :  { %s6702_s14 = smov 0   ;;  %s6704_s15 = smov 0  }
   0x6 LB: > { %s6719_s16 = sadd.s32 4294967295, %s6667_s15   ;;  %s4858_s17 = sadd.s32 4294967294, %s6667_s15   ;;  %s6667_s15 = sphi %s6704_s15, %s7697_s15   ;;  %s6663_s14 = sphi %s6702_s14, %s7696_s14   ;;  %s6659_s13 = sphi %s6700_s13, %s7695_s13   ;;  %s6655_s12 = sphi %s6698_s12, %s7694_s12  }
   0x7   : > { %s6723_s18 = sadd.s32 1, %s6667_s15   ;;  %s48_s19 = sadd.s32 1, %s6663_s14 }
   0x8   : > { %s45_s20 = ssub.s32 %s6667_s15, %s6723_s18  ;;  %p55_p0 = scmp.ne.s32.totalorder %s6663_s14, %s6659_s13 }
   0x9   : > { %p46_p1 = scmp.eq.s32.totalorder %s45_s20, 0  ;;  %p56_p2 = scmp.eq.s32.totalorder %s6667_s15, 0 }
   0xa   : > { %p61_p3 = scmp.ne.s32.totalorder %s6659_s13, %s6655_s12  ;;  %p7671_p4 = scmp.eq.s32.totalorder %s6719_s16, 0 }
   0xb   : > { %s6735_s21 = scalar_select %p46_p1, %s6663_s14, %s48_s19  }
   0xc   : > { %p6737_p5 = por %p56_p2, %p55_p0  ;;  %p6743_p6 = por %p7671_p4, %p61_p3 }
   0xd   : > { %p106_p7 = scmp.eq.s32.totalorder %s6719_s16, 1  ;;  %p112_p8 = scmp.eq.s32.totalorder %s4858_s17, 1 }
   0xe   : > { %s7677_s23 = scalar_select %p6743_p6, 1, 0 }
   0xf   : > { %p4859_p9 = scmp.ge.s32.totalorder %s6667_s15, 1  ;;  %p119_p10 = scmp.lt.s32.totalorder %s6667_s15, 3 }
  0x10   : > { %p6750_p11 = por %p106_p7, %p55_p0  ;;  %p6754_p12 = por %p112_p8, %p61_p3 }
  0x11   : > { %p6758_p13 = pnand %p4859_p9, %p119_p10  ;;  %s6669_s27 = smov [#allocation7]  }
  0x12   : > { %s7678_s24 = scalar_select %p6750_p11, 1, 0 }
  0x13   : > { %s7679_s25 = scalar_select %p6754_p12, 1, 0 }
  0x14   : > { %s7680_s26 = scalar_select %p6758_p13, 1, 0 }
  0x15   : > { %p5535_p2 = pneg %p6758_p13  ;;  %s145_s28 = sshll.u32 %s6669_s27, 4  ;;  %s146_s28 = int_to_ptr.vmem [resolvable:$true] %s145_s28 }
  0x16   : > { %p5552_p4 = scmp.lt.s32.totalorder %s6667_s15, 2  ;;  %p7681_p0 = scmp.eq.s32.totalorder %s6719_s16, 0 }
  0x17   : > { %s6670_s4 = smov [#allocation2]   ;;  %s6507_s8 = scalar_lea.hbm %s7669_s2, 384 }
  0x18   : > { %p6768_p7 = pnand %p5535_p2, %p7681_p0  ;;  %p6774_p3 = pnand %p5552_p4, %p6737_p5 }
  0x19   : > { %s131_s5 = sshll.u32 %s6670_s4, 4  ;;  %p6508_p8 = scmp.ne.s32.totalorder %s7669_s2, %s6507_s8  ;;  %s6778_s5 = int_to_ptr.vmem [resolvable:$true] %s131_s5 }
  0x1a   : > { %s7683_s30 = scalar_select %p6774_p3, 1, 0 }
  0x1b   : > { %p6509_p9 = pneg %p6768_p7  ;;  %p6514_p10 = scmp.lt.u32.totalorder %s6507_s8, %s7669_s2 }
  0x1d   : > { %p6510_p4 = pnand %p6509_p9, %p6508_p8 }
  0x1f   : > { %p6511_p5 = pneg %p6510_p4 }
  0x21   : > { %p6516_p2 = pnand %p6514_p10, %p6511_p5 }
  0x23   : > { %6519 = shalt.err (!%p6516_p2)
}
  0x24   : > { %s6520_s19 = scalar_lea.vmem %s146_s28, 384  ;;  %p6528_p11 = scmp.lt.s32.totalorder %s146_s28, %s146_s28 }
  0x25   : > { %p6521_p0 = scmp.ne.s32.totalorder %s146_s28, %s6520_s19  ;;  %p6529_p6 = scmp.lt.s32.totalorder %s6520_s19, %s6520_s19 }
  0x27   : > { %p6523_p1 = pnand %p6521_p0, %p6509_p9  ;;  %p6530_p13 = por %p6529_p6, %p6528_p11 }
  0x29   : > { %p6524_p12 = pneg %p6523_p1 }
  0x2b   : > { %p6531_p3 = pnand %p6530_p13, %p6524_p12 }
  0x2d   : > { %6534 = shalt.err (!%p6531_p3)
}
  0x2e   : > { %5541 = dma.hbm_to_vmem [thread:$0]  (!%p6768_p7), %s7669_s2, 384, %s146_s28, [#allocation6]  }
  0x2f   : > { %s6535_s6 = scalar_lea.hbm %s7667_s0, 1536 }
  0x30   : > { %p6536_p1 = scmp.ne.s32.totalorder %s7667_s0, %s6535_s6  ;;  %p6542_p12 = scmp.lt.u32.totalorder %s6535_s6, %s7667_s0 }
  0x32   : > { %p6538_p6 = pnand %p6536_p1, %p6509_p9 }
  0x34   : > { %p6539_p11 = pneg %p6538_p6 }
  0x36   : > { %p6544_p13 = pnand %p6542_p12, %p6539_p11 }
  0x38   : > { %6547 = shalt.err (!%p6544_p13)
}
  0x39   : > { %s6548_s28 = scalar_lea.vmem %s6778_s5, 1536  ;;  %p6556_p5 = scmp.lt.s32.totalorder %s6778_s5, %s6778_s5 }
  0x3a   : > { %p6549_p3 = scmp.ne.s32.totalorder %s6778_s5, %s6548_s28  ;;  %p6557_p10 = scmp.lt.s32.totalorder %s6548_s28, %s6548_s28 }
  0x3c   : > { %p6551_p8 = pnand %p6549_p3, %p6509_p9  ;;  %p6558_p2 = por %p6557_p10, %p6556_p5 }
  0x3e   : > { %p6552_p4 = pneg %p6551_p8 }
  0x40   : > { %p6559_p0 = pnand %p6558_p2, %p6552_p4 }
  0x42   : > { %6562 = shalt.err (!%p6559_p0)
}
  0x43   : > { %s6671_s11 = smov 768   ;;  %s6672_s17 = smov 48  }
  0x44   : > { %5538 = dma.hbm_to_vmem [thread:$0]  (!%p6768_p7), %s7667_s0, 1536, %s6778_s5, [#allocation3], %s6671_s11, %s6671_s11, %s6672_s17  }
  0x45   : > { %s156_s22 = sand.u32 1, %s6667_s15   ;;  %s158_s27 = sand.u32 1, %s6663_s14  }
  0x46   : > { %s5519_s4 = smul.u32 4608, %s158_s27  ;;  %s6840_s28 = scalar_lea.sflag [#allocation6], %s156_s22 }
  0x47   : > { %s5520_s6 = smul.u32 73728, %s6667_s15  ;;  %p7684_p9 = scmp.ne.s32.totalorder %s7683_s30, 0 }
  0x48   : > { %s160_s29 = scalar_lea.vmem [#allocation5], %s5519_s4  ;;  %s6568_s27 = scalar_lea.hbm %s7668_s1, 147456 }
  0x49   : > { %s6836_s9 = scalar_lea.hbm %s7668_s1, %s5520_s6  ;;  %s167_s10 = sshll.u32 %s160_s29, 4  ;;  %s6838_s10 = int_to_ptr.vmem [resolvable:$true] %s167_s10 }
  0x4a   : > { %s6563_s5 = scalar_lea.hbm %s6836_s9, 73728  ;;  %p6565_p1 = pneg %p7684_p9 }
  0x4b   : > { %p6564_p7 = scmp.ne.s32.totalorder %s6836_s9, %s6563_s5  ;;  %p6569_p12 = scmp.lt.u32.totalorder %s6836_s9, %s7668_s1 }
  0x4c   : > { %p6570_p13 = scmp.lt.u32.totalorder %s6568_s27, %s6563_s5  ;;  %p6572_p8 = scmp.lt.u32.totalorder %s6563_s5, %s6836_s9 }
  0x4d   : > { %p6566_p6 = pnand %p6565_p1, %p6564_p7 }
  0x4e   : > { %p6571_p3 = por %p6570_p13, %p6569_p12 }
  0x4f   : > { %p6567_p11 = pneg %p6566_p6 }
  0x50   : > { %p6573_p4 = por %p6572_p8, %p6571_p3 }
  0x52   : > { %p6574_p5 = pnand %p6573_p4, %p6567_p11 }
  0x54   : > { %6577 = shalt.err (!%p6574_p5)
}
  0x55   : > { %s6578_s22 = scalar_lea.vmem %s6838_s10, 73728  ;;  %s6673_s4 = smov [#allocation5]  }
  0x56   : > { %p6579_p10 = scmp.ne.s32.totalorder %s6838_s10, %s6578_s22  ;;  %s6583_s8 = sshll.u32 %s6673_s4, 4  ;;  %s6584_s8 = int_to_ptr.vmem [resolvable:$false] %s6583_s8 }
  0x57   : > { %s6585_s29 = scalar_lea.vmem %s6584_s8, 147456  ;;  %p6586_p7 = scmp.lt.s32.totalorder %s6838_s10, %s6584_s8 }
  0x58   : > { %p6581_p2 = pnand %p6579_p10, %p6565_p1  ;;  %p6587_p6 = scmp.lt.s32.totalorder %s6585_s29, %s6578_s22 }
  0x5a   : > { %p6582_p0 = pneg %p6581_p2  ;;  %p6588_p12 = por %p6587_p6, %p6586_p7 }
  0x5c   : > { %p6589_p13 = pnand %p6588_p12, %p6582_p0 }
  0x5e   : > { %6592 = shalt.err (!%p6589_p13)
}
  0x5f   : > { %5545 = dma.hbm_to_vmem [thread:$0]  (!%p7684_p9), %s6836_s9, 73728, %s6838_s10, %s6840_s28, %s6671_s11, %s6671_s11, %s6672_s17  }
  0x60   : > { %p7685_p1 = scmp.ne.s32.totalorder %s7680_s26, 0 }
  0x61   : > { %p7686_p11 = scmp.eq.s32.totalorder (!%p7685_p1), %s6719_s16, 0 }
  0x62   : > { %179 = sbr.rel (%p7685_p1) target bundleno = 952 (0x3b8), region = 32 }
  0x69   : > { %6638 = dma.done.wait (%p7686_p11), [#allocation3], 1536   ;;  %p7687_p3 = pmov %p7686_p11 }
  0x6a   : > { %s185_s30 = sand.u32 1, %s6719_s16   ;;  %s6879_s5 = sand.u32 1, %s6659_s13  }
  0x6b   : > { %6640 = vsyncadd (%p7687_p3), [#allocation3], 4294965760  ;;  %s5521_s19 = smul.u32 4608, %s6879_s5  ;;  %s186_s20 = scalar_lea.sflag [#allocation6], %s185_s30 }
  0x6c   : > { %p7688_p9 = scmp.ne.s32.totalorder %s7677_s23, 0 }
  0x6d   : > { %s6882_s27 = scalar_lea.vmem [#allocation5], %s5521_s19 }
  0x6e   : > { %6642 = dma.done.wait (%p7688_p9), %s186_s20, 73728  }
  0x6f   : > { %6644 = vsyncadd (%p7688_p9), %s186_s20, 4294893568  ;;  %p7689_p8 = pmov %p7687_p3 }
  0x70   : > { %p7690_p4 = pmov %p7687_p3 }
  0x71   : > { %6646 = dma.done.wait (%p7689_p8), [#allocation6], 384  }
  0x72   : > { %6648 = vsyncadd (%p7690_p4), [#allocation6], 4294966912  ;;  %v5595_v0 = vld [vmem:[%s6882_s27 + $0x4] ss:$48 sps:$4 sm:$0xff]   ;;  %v5597_v1 = vld [vmem:[%s6882_s27 + $0xc] ss:$48 sps:$4 sm:$0xff]  }
  0x73   : > { %3759 = vmatprep.subr.bf16.mxu0 %v5595_v0  ;;  %v5599_v2 = vld [vmem:[%s6882_s27] ss:$48 sps:$4 sm:$0xff]   ;;  %v5600_v3 = vld [vmem:[%s6882_s27 + $0x8] ss:$48 sps:$4 sm:$0xff]   ;;  %3888 = vmatprep.subr.bf16.mxu1 %v5597_v1  ;;  %v5601_v4 = vld [vmem:[%s6882_s27 + $0x64] ss:$48 sps:$4 sm:$0xff]  }
  0x74   : > { %3760 = vmatpush1.bf16.msra.mxu0 %v5599_v2  ;;  %3889 = vmatpush1.bf16.msra.mxu1 %v5600_v3  ;;  %v5603_v5 = vld [vmem:[%s6882_s27 + $0x6c] ss:$48 sps:$4 sm:$0xff]   ;;  %v5605_v6 = vld [vmem:[%s6882_s27 + $0x60] ss:$48 sps:$4 sm:$0xff]   ;;  %v5606_v7 = vld [vmem:[%s6882_s27 + $0x68] ss:$48 sps:$4 sm:$0xff]  }
  0x75   : > { %3761 = vmatprep.subr.bf16.mxu0 %v5601_v4  ;;  %3890 = vmatprep.subr.bf16.mxu1 %v5603_v5  ;;  %v5607_v8 = vld [vmem:[%s6882_s27 + $0xc4] ss:$48 sps:$4 sm:$0xff]   ;;  %v5609_v9 = vld [vmem:[%s6882_s27 + $0xcc] ss:$48 sps:$4 sm:$0xff]   ;;  %v5611_v10 = vld [vmem:[%s6882_s27 + $0xc0] ss:$48 sps:$4 sm:$0xff]  }
  0x76   : > { %v5612_v11 = vld [vmem:[%s6882_s27 + $0xc8] ss:$48 sps:$4 sm:$0xff]   ;;  %v5613_v12 = vld [vmem:[%s6882_s27 + $0x124] ss:$48 sps:$4 sm:$0xff]   ;;  %v5615_v13 = vld [vmem:[%s6882_s27 + $0x12c] ss:$48 sps:$4 sm:$0xff]  }
  0x77   : > { %v5617_v14 = vld [vmem:[%s6882_s27 + $0x120] ss:$48 sps:$4 sm:$0xff]   ;;  %v5618_v15 = vld [vmem:[%s6882_s27 + $0x128] ss:$48 sps:$4 sm:$0xff]   ;;  %v5619_v16 = vld [vmem:[%s6882_s27 + $0x184] ss:$48 sps:$4 sm:$0xff]  }
  0x78   : > { %3762 = vmatpush1.bf16.msra.mxu0 %v5605_v6  ;;  %3891 = vmatpush1.bf16.msra.mxu1 %v5606_v7  ;;  %v5621_v17 = vld [vmem:[%s6882_s27 + $0x18c] ss:$48 sps:$4 sm:$0xff]   ;;  %v5623_v18 = vld [vmem:[%s6882_s27 + $0x180] ss:$48 sps:$4 sm:$0xff]   ;;  %v5624_v19 = vld [vmem:[%s6882_s27 + $0x188] ss:$48 sps:$4 sm:$0xff]  }
  0x79   : > { %3763 = vmatprep.subr.bf16.mxu0 %v5607_v8  ;;  %3892 = vmatprep.subr.bf16.mxu1 %v5609_v9  ;;  %v5625_v20 = vld [vmem:[%s6882_s27 + $0x1e4] ss:$48 sps:$4 sm:$0xff]   ;;  %v5627_v21 = vld [vmem:[%s6882_s27 + $0x1ec] ss:$48 sps:$4 sm:$0xff]   ;;  %v5629_v22 = vld [vmem:[%s6882_s27 + $0x1e0] ss:$48 sps:$4 sm:$0xff]  }
  0x7a   : > { %v5630_v23 = vld [vmem:[%s6882_s27 + $0x1e8] ss:$48 sps:$4 sm:$0xff]   ;;  %v5631_v24 = vld [vmem:[%s6882_s27 + $0x244] ss:$48 sps:$4 sm:$0xff]   ;;  %v5633_v25 = vld [vmem:[%s6882_s27 + $0x24c] ss:$48 sps:$4 sm:$0xff]  }
  0x7b   : > { %v5635_v26 = vld [vmem:[%s6882_s27 + $0x240] ss:$48 sps:$4 sm:$0xff]   ;;  %v5636_v27 = vld [vmem:[%s6882_s27 + $0x248] ss:$48 sps:$4 sm:$0xff]   ;;  %v5637_v28 = vld [vmem:[%s6882_s27 + $0x2a4] ss:$48 sps:$4 sm:$0xff]  }
  0x7c   : > { %3764 = vmatpush1.bf16.msra.mxu0 %v5611_v10  ;;  %3893 = vmatpush1.bf16.msra.mxu1 %v5612_v11  ;;  %v5639_v29 = vld [vmem:[%s6882_s27 + $0x2ac] ss:$48 sps:$4 sm:$0xff]   ;;  %v5641_v30 = vld [vmem:[%s6882_s27 + $0x2a0] ss:$48 sps:$4 sm:$0xff]   ;;  %v5642_v31 = vld [vmem:[%s6882_s27 + $0x2a8] ss:$48 sps:$4 sm:$0xff]  }
  0x7d   : > { %3765 = vmatprep.subr.bf16.mxu0 %v5613_v12  ;;  %3894 = vmatprep.subr.bf16.mxu1 %v5615_v13  ;;  %v5643_v32 = vld [vmem:[%s6882_s27 + $0x304] ss:$48 sps:$4 sm:$0xff]   ;;  %v5645_v33 = vld [vmem:[%s6882_s27 + $0x30c] ss:$48 sps:$4 sm:$0xff]   ;;  %v5647_v34 = vld [vmem:[%s6882_s27 + $0x300] ss:$48 sps:$4 sm:$0xff]  }
  0x7e   : > { %v5648_v35 = vld [vmem:[%s6882_s27 + $0x308] ss:$48 sps:$4 sm:$0xff]   ;;  %v5649_v36 = vld [vmem:[%s6882_s27 + $0x364] ss:$48 sps:$4 sm:$0xff]   ;;  %v5651_v37 = vld [vmem:[%s6882_s27 + $0x36c] ss:$48 sps:$4 sm:$0xff]  }
  0x7f   : > { %v5653_v38 = vld [vmem:[%s6882_s27 + $0x360] ss:$48 sps:$4 sm:$0xff]   ;;  %v5654_v39 = vld [vmem:[%s6882_s27 + $0x368] ss:$48 sps:$4 sm:$0xff]   ;;  %v5655_v40 = vld [vmem:[%s6882_s27 + $0x3c4] ss:$48 sps:$4 sm:$0xff]  }
  0x80   : > { %3766 = vmatpush1.bf16.msra.mxu0 %v5617_v14  ;;  %3895 = vmatpush1.bf16.msra.mxu1 %v5618_v15  ;;  %v5657_v41 = vld [vmem:[%s6882_s27 + $0x3cc] ss:$48 sps:$4 sm:$0xff]   ;;  %v5659_v42 = vld [vmem:[%s6882_s27 + $0x3c0] ss:$48 sps:$4 sm:$0xff]   ;;  %v5660_v43 = vld [vmem:[%s6882_s27 + $0x3c8] ss:$48 sps:$4 sm:$0xff]  }
  0x81   : > { %3767 = vmatprep.subr.bf16.mxu0 %v5619_v16  ;;  %3896 = vmatprep.subr.bf16.mxu1 %v5621_v17  ;;  %v5661_v44 = vld [vmem:[%s6882_s27 + $0x424] ss:$48 sps:$4 sm:$0xff]   ;;  %v5663_v45 = vld [vmem:[%s6882_s27 + $0x42c] ss:$48 sps:$4 sm:$0xff]   ;;  %v5665_v48 = vld [vmem:[%s6882_s27 + $0x420] ss:$48 sps:$4 sm:$0xff]  }
  0x82   : > { %v218_v46 = vld [vmem:[#allocation2 + $0x8] sm:$0xff]  ;;  %v224_v47 = vld [vmem:[#allocation2 + $0x38] sm:$0xff]  ;;  %v5667_v51 = vld [vmem:[%s6882_s27 + $0x484] ss:$48 sps:$4 sm:$0xff]   ;;  %s811_s23 = smul.u32 1536, %s6719_s16  ;;  %s4750_s22 = scalar_lea.sflag [#allocation4], %s6879_s5 }
  0x83   : > { %v5666_v49 = vld [vmem:[%s6882_s27 + $0x428] ss:$48 sps:$4 sm:$0xff]   ;;  %v6940_v50 = vpack.c.bf16 %v224_v47, %v218_v46  ;;  %v5669_v52 = vld [vmem:[%s6882_s27 + $0x48c] ss:$48 sps:$4 sm:$0xff]   ;;  %v5671_v53 = vld [vmem:[%s6882_s27 + $0x480] ss:$48 sps:$4 sm:$0xff]  }
  0x84   : > { %3768 = vmatpush1.bf16.msra.mxu0 %v5623_v18  ;;  %3897 = vmatpush1.bf16.msra.mxu1 %v5624_v19  ;;  %v5672_v54 = vld [vmem:[%s6882_s27 + $0x488] ss:$48 sps:$4 sm:$0xff]   ;;  %v5673_v55 = vld [vmem:[%s6882_s27 + $0x4e4] ss:$48 sps:$4 sm:$0xff]   ;;  %v5675_v56 = vld [vmem:[%s6882_s27 + $0x4ec] ss:$48 sps:$4 sm:$0xff]   ;;  %s7618_s7 = scalar_lea.hbm %s7670_s3, %s811_s23 }
  0x85   : > { %3769 = vmatprep.subr.bf16.mxu0 %v5625_v20  ;;  %3898 = vmatprep.subr.bf16.mxu1 %v5627_v21  ;;  %v5677_v57 = vld [vmem:[%s6882_s27 + $0x4e0] ss:$48 sps:$4 sm:$0xff]   ;;  %v5678_v58 = vld [vmem:[%s6882_s27 + $0x4e8] ss:$48 sps:$4 sm:$0xff]   ;;  %v5679_v59 = vld [vmem:[%s6882_s27 + $0x544] ss:$48 sps:$4 sm:$0xff]  }
  0x86   : > { %3791 = vmatprep.mubr.bf16.mxu0 %v6940_v50  ;;  %3920 = vmatprep.mubr.bf16.mxu1 %v6940_v50  ;;  %v5681_v60 = vld [vmem:[%s6882_s27 + $0x54c] ss:$48 sps:$4 sm:$0xff]   ;;  %v5683_v61 = vld [vmem:[%s6882_s27 + $0x540] ss:$48 sps:$4 sm:$0xff]   ;;  %v5684_v62 = vld [vmem:[%s6882_s27 + $0x548] ss:$48 sps:$4 sm:$0xff]  }
  0x87   : > { %v5685_v63 = vld [vmem:[%s6882_s27 + $0x5a4] ss:$48 sps:$4 sm:$0xff]   ;;  %v5687_v0 = vld [vmem:[%s6882_s27 + $0x5ac] ss:$48 sps:$4 sm:$0xff]   ;;  %v5689_v1 = vld [vmem:[%s6882_s27 + $0x5a0] ss:$48 sps:$4 sm:$0xff]  }
  0x88   : > { %3770 = vmatpush1.bf16.msra.mxu0 %v5629_v22  ;;  %3899 = vmatpush1.bf16.msra.mxu1 %v5630_v23  ;;  %v5690_v2 = vld [vmem:[%s6882_s27 + $0x5a8] ss:$48 sps:$4 sm:$0xff]   ;;  %v5693_v3 = vld [vmem:[%s6882_s27 + $0x604] ss:$48 sps:$4 sm:$0xff]   ;;  %v5696_v6 = vld [vmem:[%s6882_s27 + $0x60c] ss:$48 sps:$4 sm:$0xff]  }
  0x89   : > { %3771 = vmatprep.subr.bf16.mxu0 %v5631_v24  ;;  %3900 = vmatprep.subr.bf16.mxu1 %v5633_v25  ;;  %v217_v4 = vld [vmem:[#allocation2] sm:$0xff]  ;;  %v223_v5 = vld [vmem:[#allocation2 + $0x30] sm:$0xff]  ;;  %v5694_v8 = vld [vmem:[%s6882_s27 + $0x608] ss:$48 sps:$4 sm:$0xff]   ;;  %s7331_s26 = sshra.s32 %s811_s23, 7  ;;  %s5522_s17 = smul.u32 192, %s6879_s5 }
  0x8a   : > { %v5691_v7 = vld [vmem:[%s6882_s27 + $0x600] ss:$48 sps:$4 sm:$0xff]   ;;  %v6964_v9 = vpack.c.bf16 %v223_v5, %v217_v4  ;;  %v5699_v10 = vld [vmem:[%s6882_s27 + $0x664] ss:$48 sps:$4 sm:$0xff]   ;;  %v5702_v11 = vld [vmem:[%s6882_s27 + $0x66c] ss:$48 sps:$4 sm:$0xff]  }
  0x8b   : > { %v5697_v12 = vld [vmem:[%s6882_s27 + $0x660] ss:$48 sps:$4 sm:$0xff]   ;;  %v5700_v13 = vld [vmem:[%s6882_s27 + $0x668] ss:$48 sps:$4 sm:$0xff]   ;;  %v5705_v14 = vld [vmem:[%s6882_s27 + $0x6c4] ss:$48 sps:$4 sm:$0xff]  }
  0x8c   : > { %3772 = vmatpush1.bf16.msra.mxu0 %v5635_v26  ;;  %3901 = vmatpush1.bf16.msra.mxu1 %v5636_v27  ;;  %v5708_v15 = vld [vmem:[%s6882_s27 + $0x6cc] ss:$48 sps:$4 sm:$0xff]   ;;  %v5703_v16 = vld [vmem:[%s6882_s27 + $0x6c0] ss:$48 sps:$4 sm:$0xff]   ;;  %v5706_v17 = vld [vmem:[%s6882_s27 + $0x6c8] ss:$48 sps:$4 sm:$0xff]  }
  0x8d   : > { %3773 = vmatprep.subr.bf16.mxu0 %v5637_v28  ;;  %3902 = vmatprep.subr.bf16.mxu1 %v5639_v29  ;;  %v5711_v18 = vld [vmem:[%s6882_s27 + $0x724] ss:$48 sps:$4 sm:$0xff]   ;;  %v5714_v19 = vld [vmem:[%s6882_s27 + $0x72c] ss:$48 sps:$4 sm:$0xff]   ;;  %v5709_v20 = vld [vmem:[%s6882_s27 + $0x720] ss:$48 sps:$4 sm:$0xff]  }
  0x8e   : > { %v5712_v21 = vld [vmem:[%s6882_s27 + $0x728] ss:$48 sps:$4 sm:$0xff]   ;;  %v5717_v22 = vld [vmem:[%s6882_s27 + $0x784] ss:$48 sps:$4 sm:$0xff]   ;;  %v5720_v23 = vld [vmem:[%s6882_s27 + $0x78c] ss:$48 sps:$4 sm:$0xff]  }
  0x8f   : > { %v5715_v24 = vld [vmem:[%s6882_s27 + $0x780] ss:$48 sps:$4 sm:$0xff]   ;;  %v5718_v25 = vld [vmem:[%s6882_s27 + $0x788] ss:$48 sps:$4 sm:$0xff]   ;;  %v5723_v26 = vld [vmem:[%s6882_s27 + $0x7e4] ss:$48 sps:$4 sm:$0xff]  }
  0x90   : > { %3774 = vmatpush1.bf16.msra.mxu0 %v5641_v30  ;;  %3903 = vmatpush1.bf16.msra.mxu1 %v5642_v31  ;;  %v5726_v27 = vld [vmem:[%s6882_s27 + $0x7ec] ss:$48 sps:$4 sm:$0xff]   ;;  %v5721_v28 = vld [vmem:[%s6882_s27 + $0x7e0] ss:$48 sps:$4 sm:$0xff]   ;;  %v5724_v29 = vld [vmem:[%s6882_s27 + $0x7e8] ss:$48 sps:$4 sm:$0xff]  }
  0x91   : > { %3775 = vmatprep.subr.bf16.mxu0 %v5643_v32  ;;  %3904 = vmatprep.subr.bf16.mxu1 %v5645_v33  ;;  %v5729_v30 = vld [vmem:[%s6882_s27 + $0x844] ss:$48 sps:$4 sm:$0xff]   ;;  %v5732_v31 = vld [vmem:[%s6882_s27 + $0x84c] ss:$48 sps:$4 sm:$0xff]   ;;  %v5745_v47 = vld [vmem:[%s6882_s27 + $0x960] ss:$48 sps:$4 sm:$0xff]  }
  0x92   : > { %v220_v32 = vld [vmem:[#allocation2 + $0x18] sm:$0xff]  ;;  %v226_v33 = vld [vmem:[#allocation2 + $0x48] sm:$0xff]  ;;  %v5775_v4 = vld [vmem:[%s6882_s27 + $0xb40] ss:$48 sps:$4 sm:$0xff]   ;;  %s814_s11 = scalar_lea.vmem [#allocation7], %s7331_s26  ;;  %s7419_s9 = scalar_lea.vmem [#allocation8], %s5522_s17 }
  0x93   : > { %v5750_v46 = vld [vmem:[%s6882_s27 + $0x96c] ss:$48 sps:$4 sm:$0xff]   ;;  %v5778_v5 = vld [vmem:[%s6882_s27 + $0xb48] ss:$48 sps:$4 sm:$0xff]   ;;  %s4763_s10 = sshll.u32 %s7419_s9, 4  ;;  %p7691_p10 = scmp.ne.s32.totalorder %s7678_s24, 0  ;;  %s7622_s10 = int_to_ptr.vmem [resolvable:$true] %s4763_s10 }
  0x94   : > { %3776 = vmatpush1.bf16.msra.mxu0 %v5647_v34  ;;  %3905 = vmatpush1.bf16.msra.mxu1 %v5648_v35  ;;  %v5727_v34 = vld [vmem:[%s6882_s27 + $0x840] ss:$48 sps:$4 sm:$0xff]   ;;  %v5730_v35 = vld [vmem:[%s6882_s27 + $0x848] ss:$48 sps:$4 sm:$0xff]   ;;  %s6593_s4 = scalar_lea.vmem %s7622_s10, 3072  ;;  %s6674_s16 = smov [#allocation8]  }
  0x95   : > { %3777 = vmatprep.subr.bf16.mxu0 %v5649_v36  ;;  %3906 = vmatprep.subr.bf16.mxu1 %v5651_v37  ;;  %v6992_v36 = vpack.c.bf16 %v226_v33, %v220_v32  ;;  %v5735_v37 = vld [vmem:[%s6882_s27 + $0x8a4] ss:$48 sps:$4 sm:$0xff]   ;;  %v5808_v32 = vld [vmem:[%s6882_s27 + $0xd28] ss:$48 sps:$4 sm:$0xff]   ;;  %p6594_p5 = scmp.ne.s32.totalorder %s7622_s10, %s6593_s4  ;;  %s6597_s8 = sshll.u32 %s6674_s16, 4  ;;  %s6598_s8 = int_to_ptr.vmem [resolvable:$false] %s6597_s8 }
  0x96   : > { %v5813_v33 = vld [vmem:[%s6882_s27 + $0xd84] ss:$48 sps:$4 sm:$0xff]   ;;  %s6599_s29 = scalar_lea.vmem %s6598_s8, 6144  ;;  %p6600_p7 = scmp.lt.s32.totalorder %s7622_s10, %s6598_s8 }
  0x97   : > { %p6595_p2 = pnand %p6594_p5, %p7691_p10  ;;  %p6601_p6 = scmp.lt.s32.totalorder %s6599_s29, %s6593_s4 }
  0x98   : > { %3778 = vmatpush1.bf16.msra.mxu0 %v5653_v38  ;;  %3907 = vmatpush1.bf16.msra.mxu1 %v5654_v39  ;;  %v5738_v38 = vld [vmem:[%s6882_s27 + $0x8ac] ss:$48 sps:$4 sm:$0xff]   ;;  %v5733_v39 = vld [vmem:[%s6882_s27 + $0x8a0] ss:$48 sps:$4 sm:$0xff]  }
  0x99   : > { %3779 = vmatprep.subr.bf16.mxu0 %v5655_v40  ;;  %3908 = vmatprep.subr.bf16.mxu1 %v5657_v41  ;;  %v5736_v40 = vld [vmem:[%s6882_s27 + $0x8a8] ss:$48 sps:$4 sm:$0xff]   ;;  %v5741_v41 = vld [vmem:[%s6882_s27 + $0x904] ss:$48 sps:$4 sm:$0xff]   ;;  %p6596_p0 = pneg %p6595_p2  ;;  %p6602_p12 = por %p6601_p6, %p6600_p7 }
  0x9b   : > { %p6603_p13 = pnand %p6602_p12, %p6596_p0 }
  0x9c   : > { %3780 = vmatpush1.bf16.msra.mxu0 %v5659_v42  ;;  %3909 = vmatpush1.bf16.msra.mxu1 %v5660_v43  ;;  %v5744_v42 = vld [vmem:[%s6882_s27 + $0x90c] ss:$48 sps:$4 sm:$0xff]   ;;  %v5739_v43 = vld [vmem:[%s6882_s27 + $0x900] ss:$48 sps:$4 sm:$0xff]  }
  0x9d   : > { %3781 = vmatprep.subr.bf16.mxu0 %v5661_v44  ;;  %3910 = vmatprep.subr.bf16.mxu1 %v5663_v45  ;;  %v5742_v44 = vld [vmem:[%s6882_s27 + $0x908] ss:$48 sps:$4 sm:$0xff]   ;;  %v5747_v45 = vld [vmem:[%s6882_s27 + $0x964] ss:$48 sps:$4 sm:$0xff]  }
  0xa0   : > { %3782 = vmatpush1.bf16.msra.mxu0 %v5665_v48  ;;  %3911 = vmatpush1.bf16.msra.mxu1 %v5666_v49  ;;  %v5748_v48 = vld [vmem:[%s6882_s27 + $0x968] ss:$48 sps:$4 sm:$0xff]   ;;  %v5753_v49 = vld [vmem:[%s6882_s27 + $0x9c4] ss:$48 sps:$4 sm:$0xff]  }
  0xa1   : > { %3783 = vmatprep.subr.bf16.mxu0 %v5667_v51  ;;  %3912 = vmatprep.subr.bf16.mxu1 %v5669_v52  ;;  %v5756_v51 = vld [vmem:[%s6882_s27 + $0x9cc] ss:$48 sps:$4 sm:$0xff]   ;;  %v5751_v52 = vld [vmem:[%s6882_s27 + $0x9c0] ss:$48 sps:$4 sm:$0xff]  }
  0xa4   : > { %3784 = vmatpush1.bf16.msra.mxu0 %v5671_v53  ;;  %3913 = vmatpush1.bf16.msra.mxu1 %v5672_v54  ;;  %v5754_v53 = vld [vmem:[%s6882_s27 + $0x9c8] ss:$48 sps:$4 sm:$0xff]   ;;  %v5759_v54 = vld [vmem:[%s6882_s27 + $0xa24] ss:$48 sps:$4 sm:$0xff]  }
  0xa5   : > { %3785 = vmatprep.subr.bf16.mxu0 %v5673_v55  ;;  %3914 = vmatprep.subr.bf16.mxu1 %v5675_v56  ;;  %v5762_v55 = vld [vmem:[%s6882_s27 + $0xa2c] ss:$48 sps:$4 sm:$0xff]   ;;  %v5757_v56 = vld [vmem:[%s6882_s27 + $0xa20] ss:$48 sps:$4 sm:$0xff]  }
  0xa8   : > { %3786 = vmatpush1.bf16.msra.mxu0 %v5677_v57  ;;  %3915 = vmatpush1.bf16.msra.mxu1 %v5678_v58  ;;  %v5760_v57 = vld [vmem:[%s6882_s27 + $0xa28] ss:$48 sps:$4 sm:$0xff]   ;;  %v5765_v58 = vld [vmem:[%s6882_s27 + $0xa84] ss:$48 sps:$4 sm:$0xff]  }
  0xa9   : > { %3787 = vmatprep.subr.bf16.mxu0 %v5679_v59  ;;  %3916 = vmatprep.subr.bf16.mxu1 %v5681_v60  ;;  %v5768_v59 = vld [vmem:[%s6882_s27 + $0xa8c] ss:$48 sps:$4 sm:$0xff]   ;;  %v5763_v60 = vld [vmem:[%s6882_s27 + $0xa80] ss:$48 sps:$4 sm:$0xff]  }
  0xac   : > { %3788 = vmatpush1.bf16.msra.mxu0 %v5683_v61  ;;  %3917 = vmatpush1.bf16.msra.mxu1 %v5684_v62  ;;  %v5766_v61 = vld [vmem:[%s6882_s27 + $0xa88] ss:$48 sps:$4 sm:$0xff]   ;;  %v5771_v62 = vld [vmem:[%s6882_s27 + $0xae4] ss:$48 sps:$4 sm:$0xff]  }
  0xad   : > { %3789 = vmatprep.subr.bf16.mxu0 %v5685_v63  ;;  %3918 = vmatprep.subr.bf16.mxu1 %v5687_v0  ;;  %v5774_v63 = vld [vmem:[%s6882_s27 + $0xaec] ss:$48 sps:$4 sm:$0xff]   ;;  %v5769_v0 = vld [vmem:[%s6882_s27 + $0xae0] ss:$48 sps:$4 sm:$0xff]  }
  0xb0   : > { %3790 = vmatpush1.bf16.msra.mxu0 %v5689_v1  ;;  %3919 = vmatpush1.bf16.msra.mxu1 %v5690_v2  ;;  %v5772_v1 = vld [vmem:[%s6882_s27 + $0xae8] ss:$48 sps:$4 sm:$0xff]   ;;  %v5777_v2 = vld [vmem:[%s6882_s27 + $0xb44] ss:$48 sps:$4 sm:$0xff]  }
  0xb1   : > { %3802 = vmatprep.subr.bf16.mxu0 %v5693_v3  ;;  %3931 = vmatprep.subr.bf16.mxu1 %v5696_v6  ;;  %v5780_v3 = vld [vmem:[%s6882_s27 + $0xb4c] ss:$48 sps:$4 sm:$0xff]   ;;  %v5783_v6 = vld [vmem:[%s6882_s27 + $0xba4] ss:$48 sps:$4 sm:$0xff]  }
  0xb3   : > { %3792 = vmatmul.mubr.bf16.vlgmr.msra.gmra.mrb[0].mxu0 %v6964_v9  ;;  %3921 = vmatmul.mubr.bf16.vlgmr.msra.gmra.mrb[0].mxu1 %v6964_v9 }
  0xb4   : > { %3803 = vmatpush1.bf16.msra.mxu0 %v5691_v7  ;;  %3932 = vmatpush1.bf16.msra.mxu1 %v5694_v8  ;;  %v5786_v7 = vld [vmem:[%s6882_s27 + $0xbac] ss:$48 sps:$4 sm:$0xff]   ;;  %v5781_v8 = vld [vmem:[%s6882_s27 + $0xba0] ss:$48 sps:$4 sm:$0xff]  }
  0xb5   : > { %3804 = vmatprep.subr.bf16.mxu0 %v5699_v10  ;;  %3933 = vmatprep.subr.bf16.mxu1 %v5702_v11  ;;  %v5784_v10 = vld [vmem:[%s6882_s27 + $0xba8] ss:$48 sps:$4 sm:$0xff]   ;;  %v5789_v11 = vld [vmem:[%s6882_s27 + $0xc04] ss:$48 sps:$4 sm:$0xff]  }
  0xb6   : > { %3834 = vmatprep.mubr.bf16.mxu0 %v6992_v36  ;;  %3963 = vmatprep.mubr.bf16.mxu1 %v6992_v36 }
  0xb8   : > { %3805 = vmatpush1.bf16.msra.mxu0 %v5697_v12  ;;  %3934 = vmatpush1.bf16.msra.mxu1 %v5700_v13  ;;  %v219_v12 = vld [vmem:[#allocation2 + $0x10] sm:$0xff]  ;;  %v225_v13 = vld [vmem:[#allocation2 + $0x40] sm:$0xff] }
  0xb9   : > { %3806 = vmatprep.subr.bf16.mxu0 %v5705_v14  ;;  %3935 = vmatprep.subr.bf16.mxu1 %v5708_v15  ;;  %v5792_v14 = vld [vmem:[%s6882_s27 + $0xc0c] ss:$48 sps:$4 sm:$0xff]   ;;  %v5787_v15 = vld [vmem:[%s6882_s27 + $0xc00] ss:$48 sps:$4 sm:$0xff]  }
  0xbc   : > { %3807 = vmatpush1.bf16.msra.mxu0 %v5703_v16  ;;  %3936 = vmatpush1.bf16.msra.mxu1 %v5706_v17  ;;  %v5790_v16 = vld [vmem:[%s6882_s27 + $0xc08] ss:$48 sps:$4 sm:$0xff]   ;;  %v7036_v17 = vpack.c.bf16 %v225_v13, %v219_v12  ;;  %v5873_v12 = vld [vmem:[%s6882_s27 + $0x1144] ss:$48 sps:$4 sm:$0xff]   ;;  %v5876_v13 = vld [vmem:[%s6882_s27 + $0x114c] ss:$48 sps:$4 sm:$0xff]  }
  0xbd   : > { %3808 = vmatprep.subr.bf16.mxu0 %v5711_v18  ;;  %3937 = vmatprep.subr.bf16.mxu1 %v5714_v19  ;;  %v5795_v18 = vld [vmem:[%s6882_s27 + $0xc64] ss:$48 sps:$4 sm:$0xff]   ;;  %v5798_v19 = vld [vmem:[%s6882_s27 + $0xc6c] ss:$48 sps:$4 sm:$0xff]  }
  0xc0   : > { %3809 = vmatpush1.bf16.msra.mxu0 %v5709_v20  ;;  %3938 = vmatpush1.bf16.msra.mxu1 %v5712_v21  ;;  %v222_v20 = vld [vmem:[#allocation2 + $0x28] sm:$0xff]  ;;  %v5793_v21 = vld [vmem:[%s6882_s27 + $0xc60] ss:$48 sps:$4 sm:$0xff]  }
  0xc1   : > { %3810 = vmatprep.subr.bf16.mxu0 %v5717_v22  ;;  %3939 = vmatprep.subr.bf16.mxu1 %v5720_v23  ;;  %v5796_v22 = vld [vmem:[%s6882_s27 + $0xc68] ss:$48 sps:$4 sm:$0xff]  }
  0xc2   : > { %v228_v23 = vld [vmem:[#allocation2 + $0x58] sm:$0xff] }
  0xc4   : > { %3811 = vmatpush1.bf16.msra.mxu0 %v5715_v24  ;;  %3940 = vmatpush1.bf16.msra.mxu1 %v5718_v25  ;;  %v5801_v24 = vld [vmem:[%s6882_s27 + $0xcc4] ss:$48 sps:$4 sm:$0xff]   ;;  %v7045_v25 = vpack.c.bf16 %v228_v23, %v222_v20  ;;  %v5880_v20 = vld [vmem:[%s6882_s27 + $0x11a8] ss:$48 sps:$4 sm:$0xff]  }
  0xc5   : > { %3812 = vmatprep.subr.bf16.mxu0 %v5723_v26  ;;  %3941 = vmatprep.subr.bf16.mxu1 %v5726_v27  ;;  %v5804_v26 = vld [vmem:[%s6882_s27 + $0xccc] ss:$48 sps:$4 sm:$0xff]   ;;  %v5799_v27 = vld [vmem:[%s6882_s27 + $0xcc0] ss:$48 sps:$4 sm:$0xff]   ;;  %v5885_v23 = vld [vmem:[%s6882_s27 + $0x14] ss:$48 sps:$4 sm:$0xff]  }
  0xc8   : > { %3813 = vmatpush1.bf16.msra.mxu0 %v5721_v28  ;;  %3942 = vmatpush1.bf16.msra.mxu1 %v5724_v29  ;;  %v5802_v28 = vld [vmem:[%s6882_s27 + $0xcc8] ss:$48 sps:$4 sm:$0xff]   ;;  %v5807_v29 = vld [vmem:[%s6882_s27 + $0xd24] ss:$48 sps:$4 sm:$0xff]  }
  0xc9   : > { %3814 = vmatprep.subr.bf16.mxu0 %v5729_v30  ;;  %3943 = vmatprep.subr.bf16.mxu1 %v5732_v31  ;;  %v5810_v30 = vld [vmem:[%s6882_s27 + $0xd2c] ss:$48 sps:$4 sm:$0xff]   ;;  %v5805_v31 = vld [vmem:[%s6882_s27 + $0xd20] ss:$48 sps:$4 sm:$0xff]  }
  0xcc   : > { %3815 = vmatpush1.bf16.msra.mxu0 %v5727_v34  ;;  %3944 = vmatpush1.bf16.msra.mxu1 %v5730_v35  ;;  %v5816_v34 = vld [vmem:[%s6882_s27 + $0xd8c] ss:$48 sps:$4 sm:$0xff]   ;;  %v5811_v35 = vld [vmem:[%s6882_s27 + $0xd80] ss:$48 sps:$4 sm:$0xff]  }
  0xcd   : > { %3816 = vmatprep.subr.bf16.mxu0 %v5735_v37  ;;  %3945 = vmatprep.subr.bf16.mxu1 %v5738_v38  ;;  %v5814_v37 = vld [vmem:[%s6882_s27 + $0xd88] ss:$48 sps:$4 sm:$0xff]   ;;  %v5819_v38 = vld [vmem:[%s6882_s27 + $0xde4] ss:$48 sps:$4 sm:$0xff]  }
  0xd0   : > { %3817 = vmatpush1.bf16.msra.mxu0 %v5733_v39  ;;  %3946 = vmatpush1.bf16.msra.mxu1 %v5736_v40  ;;  %v5822_v39 = vld [vmem:[%s6882_s27 + $0xdec] ss:$48 sps:$4 sm:$0xff]   ;;  %v5817_v40 = vld [vmem:[%s6882_s27 + $0xde0] ss:$48 sps:$4 sm:$0xff]  }
  0xd1   : > { %3818 = vmatprep.subr.bf16.mxu0 %v5741_v41  ;;  %3947 = vmatprep.subr.bf16.mxu1 %v5744_v42  ;;  %v5820_v41 = vld [vmem:[%s6882_s27 + $0xde8] ss:$48 sps:$4 sm:$0xff]   ;;  %v5825_v42 = vld [vmem:[%s6882_s27 + $0xe44] ss:$48 sps:$4 sm:$0xff]  }
  0xd4   : > { %3819 = vmatpush1.bf16.msra.mxu0 %v5739_v43  ;;  %3948 = vmatpush1.bf16.msra.mxu1 %v5742_v44  ;;  %v5828_v43 = vld [vmem:[%s6882_s27 + $0xe4c] ss:$48 sps:$4 sm:$0xff]   ;;  %v5823_v44 = vld [vmem:[%s6882_s27 + $0xe40] ss:$48 sps:$4 sm:$0xff]  }
  0xd5   : > { %3820 = vmatprep.subr.bf16.mxu0 %v5747_v45  ;;  %3949 = vmatprep.subr.bf16.mxu1 %v5750_v46  ;;  %v5826_v45 = vld [vmem:[%s6882_s27 + $0xe48] ss:$48 sps:$4 sm:$0xff]   ;;  %v5831_v46 = vld [vmem:[%s6882_s27 + $0xea4] ss:$48 sps:$4 sm:$0xff]  }
  0xd8   : > { %3821 = vmatpush1.bf16.msra.mxu0 %v5745_v47  ;;  %3950 = vmatpush1.bf16.msra.mxu1 %v5748_v48  ;;  %v5834_v47 = vld [vmem:[%s6882_s27 + $0xeac] ss:$48 sps:$4 sm:$0xff]   ;;  %v5829_v48 = vld [vmem:[%s6882_s27 + $0xea0] ss:$48 sps:$4 sm:$0xff]  }
  0xd9   : > { %3822 = vmatprep.subr.bf16.mxu0 %v5753_v49  ;;  %3951 = vmatprep.subr.bf16.mxu1 %v5756_v51  ;;  %v5832_v49 = vld [vmem:[%s6882_s27 + $0xea8] ss:$48 sps:$4 sm:$0xff]   ;;  %v5837_v51 = vld [vmem:[%s6882_s27 + $0xf04] ss:$48 sps:$4 sm:$0xff]  }
  0xdc   : > { %3823 = vmatpush1.bf16.msra.mxu0 %v5751_v52  ;;  %3952 = vmatpush1.bf16.msra.mxu1 %v5754_v53  ;;  %v5840_v52 = vld [vmem:[%s6882_s27 + $0xf0c] ss:$48 sps:$4 sm:$0xff]   ;;  %v5835_v53 = vld [vmem:[%s6882_s27 + $0xf00] ss:$48 sps:$4 sm:$0xff]  }
  0xdd   : > { %3824 = vmatprep.subr.bf16.mxu0 %v5759_v54  ;;  %3953 = vmatprep.subr.bf16.mxu1 %v5762_v55  ;;  %v5838_v54 = vld [vmem:[%s6882_s27 + $0xf08] ss:$48 sps:$4 sm:$0xff]   ;;  %v5843_v55 = vld [vmem:[%s6882_s27 + $0xf64] ss:$48 sps:$4 sm:$0xff]  }
  0xe0   : > { %3825 = vmatpush1.bf16.msra.mxu0 %v5757_v56  ;;  %3954 = vmatpush1.bf16.msra.mxu1 %v5760_v57  ;;  %v5846_v56 = vld [vmem:[%s6882_s27 + $0xf6c] ss:$48 sps:$4 sm:$0xff]   ;;  %v5841_v57 = vld [vmem:[%s6882_s27 + $0xf60] ss:$48 sps:$4 sm:$0xff]  }
  0xe1   : > { %3826 = vmatprep.subr.bf16.mxu0 %v5765_v58  ;;  %3955 = vmatprep.subr.bf16.mxu1 %v5768_v59  ;;  %v5844_v58 = vld [vmem:[%s6882_s27 + $0xf68] ss:$48 sps:$4 sm:$0xff]   ;;  %v5849_v59 = vld [vmem:[%s6882_s27 + $0xfc4] ss:$48 sps:$4 sm:$0xff]  }
  0xe4   : > { %3827 = vmatpush1.bf16.msra.mxu0 %v5763_v60  ;;  %3956 = vmatpush1.bf16.msra.mxu1 %v5766_v61  ;;  %v5852_v60 = vld [vmem:[%s6882_s27 + $0xfcc] ss:$48 sps:$4 sm:$0xff]   ;;  %v5847_v61 = vld [vmem:[%s6882_s27 + $0xfc0] ss:$48 sps:$4 sm:$0xff]  }
  0xe5   : > { %3828 = vmatprep.subr.bf16.mxu0 %v5771_v62  ;;  %3957 = vmatprep.subr.bf16.mxu1 %v5774_v63  ;;  %v5850_v62 = vld [vmem:[%s6882_s27 + $0xfc8] ss:$48 sps:$4 sm:$0xff]   ;;  %v5855_v63 = vld [vmem:[%s6882_s27 + $0x1024] ss:$48 sps:$4 sm:$0xff]  }
  0xe8   : > { %3829 = vmatpush1.bf16.msra.mxu0 %v5769_v0  ;;  %3958 = vmatpush1.bf16.msra.mxu1 %v5772_v1  ;;  %v5858_v0 = vld [vmem:[%s6882_s27 + $0x102c] ss:$48 sps:$4 sm:$0xff]   ;;  %v5853_v1 = vld [vmem:[%s6882_s27 + $0x1020] ss:$48 sps:$4 sm:$0xff]  }
  0xe9   : > { %3830 = vmatprep.subr.bf16.mxu0 %v5777_v2  ;;  %3959 = vmatprep.subr.bf16.mxu1 %v5780_v3  ;;  %v5856_v2 = vld [vmem:[%s6882_s27 + $0x1028] ss:$48 sps:$4 sm:$0xff]   ;;  %v5861_v3 = vld [vmem:[%s6882_s27 + $0x1084] ss:$48 sps:$4 sm:$0xff]  }
  0xec   : > { %3831 = vmatpush1.bf16.msra.mxu0 %v5775_v4  ;;  %3960 = vmatpush1.bf16.msra.mxu1 %v5778_v5  ;;  %v5864_v4 = vld [vmem:[%s6882_s27 + $0x108c] ss:$48 sps:$4 sm:$0xff]   ;;  %v5859_v5 = vld [vmem:[%s6882_s27 + $0x1080] ss:$48 sps:$4 sm:$0xff]  }
  0xed   : > { %3832 = vmatprep.subr.bf16.mxu0 %v5783_v6  ;;  %3961 = vmatprep.subr.bf16.mxu1 %v5786_v7  ;;  %v5862_v6 = vld [vmem:[%s6882_s27 + $0x1088] ss:$48 sps:$4 sm:$0xff]   ;;  %v5867_v7 = vld [vmem:[%s6882_s27 + $0x10e4] ss:$48 sps:$4 sm:$0xff]  }
  0xf0   : > { %3833 = vmatpush1.bf16.msra.mxu0 %v5781_v8  ;;  %3962 = vmatpush1.bf16.msra.mxu1 %v5784_v10  ;;  %v5870_v8 = vld [vmem:[%s6882_s27 + $0x10ec] ss:$48 sps:$4 sm:$0xff]   ;;  %v5865_v10 = vld [vmem:[%s6882_s27 + $0x10e0] ss:$48 sps:$4 sm:$0xff]  }
  0xf1   : > { %3845 = vmatprep.subr.bf16.mxu0 %v5789_v11  ;;  %3974 = vmatprep.subr.bf16.mxu1 %v5792_v14  ;;  %v5868_v11 = vld [vmem:[%s6882_s27 + $0x10e8] ss:$48 sps:$4 sm:$0xff]   ;;  %v5871_v14 = vld [vmem:[%s6882_s27 + $0x1140] ss:$48 sps:$4 sm:$0xff]  }
  0xf3   : > { %3835 = vmatmul.mubr.bf16.vlgmr.msra.gmra.mrb[0].mxu0 %v7036_v17  ;;  %3964 = vmatmul.mubr.bf16.vlgmr.msra.gmra.mrb[0].mxu1 %v7036_v17 }
  0xf4   : > { %3846 = vmatpush1.bf16.msra.mxu0 %v5787_v15  ;;  %3975 = vmatpush1.bf16.msra.mxu1 %v5790_v16  ;;  %v5874_v15 = vld [vmem:[%s6882_s27 + $0x1148] ss:$48 sps:$4 sm:$0xff]   ;;  %v5879_v16 = vld [vmem:[%s6882_s27 + $0x11a4] ss:$48 sps:$4 sm:$0xff]  }
  0xf5   : > { %3847 = vmatprep.subr.bf16.mxu0 %v5795_v18  ;;  %3976 = vmatprep.subr.bf16.mxu1 %v5798_v19  ;;  %v5882_v18 = vld [vmem:[%s6882_s27 + $0x11ac] ss:$48 sps:$4 sm:$0xff]   ;;  %v5877_v19 = vld [vmem:[%s6882_s27 + $0x11a0] ss:$48 sps:$4 sm:$0xff]  }
  0xf6   : > { %3877 = vmatprep.mubr.bf16.mxu0 %v7045_v25  ;;  %4006 = vmatprep.mubr.bf16.mxu1 %v7045_v25 }
  0xf8   : > { %3848 = vmatpush1.bf16.msra.mxu0 %v5793_v21  ;;  %3977 = vmatpush1.bf16.msra.mxu1 %v5796_v22  ;;  %v221_v21 = vld [vmem:[#allocation2 + $0x20] sm:$0xff]  ;;  %v227_v22 = vld [vmem:[#allocation2 + $0x50] sm:$0xff] }
  0xf9   : > { %3849 = vmatprep.subr.bf16.mxu0 %v5801_v24  ;;  %3978 = vmatprep.subr.bf16.mxu1 %v5804_v26  ;;  %v5888_v24 = vld [vmem:[%s6882_s27 + $0x1c] ss:$48 sps:$4 sm:$0xff]   ;;  %v7106_v26 = vpack.c.bf16 %v227_v22, %v221_v21  ;;  %v5969_v21 = vld [vmem:[%s6882_s27 + $0x554] ss:$48 sps:$4 sm:$0xff]  }
  0xfa   : > { %v5972_v22 = vld [vmem:[%s6882_s27 + $0x55c] ss:$48 sps:$4 sm:$0xff]  }
  0xfc   : > { %3850 = vmatpush1.bf16.msra.mxu0 %v5799_v27  ;;  %3979 = vmatpush1.bf16.msra.mxu1 %v5802_v28  ;;  %v5883_v27 = vld [vmem:[%s6882_s27 + $0x10] ss:$48 sps:$4 sm:$0xff]   ;;  %v5886_v28 = vld [vmem:[%s6882_s27 + $0x18] ss:$48 sps:$4 sm:$0xff]  }
  0xfd   : > { %3851 = vmatprep.subr.bf16.mxu0 %v5807_v29  ;;  %3980 = vmatprep.subr.bf16.mxu1 %v5810_v30  ;;  %v5891_v29 = vld [vmem:[%s6882_s27 + $0x74] ss:$48 sps:$4 sm:$0xff]   ;;  %v5894_v30 = vld [vmem:[%s6882_s27 + $0x7c] ss:$48 sps:$4 sm:$0xff]  }
 0x100   : > { %3852 = vmatpush1.bf16.msra.mxu0 %v5805_v31  ;;  %3981 = vmatpush1.bf16.msra.mxu1 %v5808_v32  ;;  %v5889_v31 = vld [vmem:[%s6882_s27 + $0x70] ss:$48 sps:$4 sm:$0xff]   ;;  %v5892_v32 = vld [vmem:[%s6882_s27 + $0x78] ss:$48 sps:$4 sm:$0xff]  }
 0x101   : > { %3853 = vmatprep.subr.bf16.mxu0 %v5813_v33  ;;  %3982 = vmatprep.subr.bf16.mxu1 %v5816_v34  ;;  %v5897_v33 = vld [vmem:[%s6882_s27 + $0xd4] ss:$48 sps:$4 sm:$0xff]   ;;  %v5900_v34 = vld [vmem:[%s6882_s27 + $0xdc] ss:$48 sps:$4 sm:$0xff]  }
 0x104   : > { %3854 = vmatpush1.bf16.msra.mxu0 %v5811_v35  ;;  %3983 = vmatpush1.bf16.msra.mxu1 %v5814_v37  ;;  %v5895_v35 = vld [vmem:[%s6882_s27 + $0xd0] ss:$48 sps:$4 sm:$0xff]   ;;  %v5898_v37 = vld [vmem:[%s6882_s27 + $0xd8] ss:$48 sps:$4 sm:$0xff]  }
 0x105   : > { %3855 = vmatprep.subr.bf16.mxu0 %v5819_v38  ;;  %3984 = vmatprep.subr.bf16.mxu1 %v5822_v39  ;;  %v5903_v38 = vld [vmem:[%s6882_s27 + $0x134] ss:$48 sps:$4 sm:$0xff]   ;;  %v5906_v39 = vld [vmem:[%s6882_s27 + $0x13c] ss:$48 sps:$4 sm:$0xff]  }
 0x108   : > { %3856 = vmatpush1.bf16.msra.mxu0 %v5817_v40  ;;  %3985 = vmatpush1.bf16.msra.mxu1 %v5820_v41  ;;  %v5901_v40 = vld [vmem:[%s6882_s27 + $0x130] ss:$48 sps:$4 sm:$0xff]   ;;  %v5904_v41 = vld [vmem:[%s6882_s27 + $0x138] ss:$48 sps:$4 sm:$0xff]  }
 0x109   : > { %3857 = vmatprep.subr.bf16.mxu0 %v5825_v42  ;;  %3986 = vmatprep.subr.bf16.mxu1 %v5828_v43  ;;  %v5909_v42 = vld [vmem:[%s6882_s27 + $0x194] ss:$48 sps:$4 sm:$0xff]   ;;  %v5912_v43 = vld [vmem:[%s6882_s27 + $0x19c] ss:$48 sps:$4 sm:$0xff]  }
 0x10c   : > { %3858 = vmatpush1.bf16.msra.mxu0 %v5823_v44  ;;  %3987 = vmatpush1.bf16.msra.mxu1 %v5826_v45  ;;  %v5907_v44 = vld [vmem:[%s6882_s27 + $0x190] ss:$48 sps:$4 sm:$0xff]   ;;  %v5910_v45 = vld [vmem:[%s6882_s27 + $0x198] ss:$48 sps:$4 sm:$0xff]  }
 0x10d   : > { %3859 = vmatprep.subr.bf16.mxu0 %v5831_v46  ;;  %3988 = vmatprep.subr.bf16.mxu1 %v5834_v47  ;;  %v5915_v46 = vld [vmem:[%s6882_s27 + $0x1f4] ss:$48 sps:$4 sm:$0xff]   ;;  %v5918_v47 = vld [vmem:[%s6882_s27 + $0x1fc] ss:$48 sps:$4 sm:$0xff]  }
 0x110   : > { %3860 = vmatpush1.bf16.msra.mxu0 %v5829_v48  ;;  %3989 = vmatpush1.bf16.msra.mxu1 %v5832_v49  ;;  %v5913_v48 = vld [vmem:[%s6882_s27 + $0x1f0] ss:$48 sps:$4 sm:$0xff]   ;;  %v5916_v49 = vld [vmem:[%s6882_s27 + $0x1f8] ss:$48 sps:$4 sm:$0xff]  }
 0x111   : > { %3861 = vmatprep.subr.bf16.mxu0 %v5837_v51  ;;  %3990 = vmatprep.subr.bf16.mxu1 %v5840_v52  ;;  %v5921_v51 = vld [vmem:[%s6882_s27 + $0x254] ss:$48 sps:$4 sm:$0xff]   ;;  %v5924_v52 = vld [vmem:[%s6882_s27 + $0x25c] ss:$48 sps:$4 sm:$0xff]  }
 0x114   : > { %3862 = vmatpush1.bf16.msra.mxu0 %v5835_v53  ;;  %3991 = vmatpush1.bf16.msra.mxu1 %v5838_v54  ;;  %v5919_v53 = vld [vmem:[%s6882_s27 + $0x250] ss:$48 sps:$4 sm:$0xff]   ;;  %v5922_v54 = vld [vmem:[%s6882_s27 + $0x258] ss:$48 sps:$4 sm:$0xff]  }
 0x115   : > { %3863 = vmatprep.subr.bf16.mxu0 %v5843_v55  ;;  %3992 = vmatprep.subr.bf16.mxu1 %v5846_v56  ;;  %v5927_v55 = vld [vmem:[%s6882_s27 + $0x2b4] ss:$48 sps:$4 sm:$0xff]   ;;  %v5930_v56 = vld [vmem:[%s6882_s27 + $0x2bc] ss:$48 sps:$4 sm:$0xff]  }
 0x118   : > { %3864 = vmatpush1.bf16.msra.mxu0 %v5841_v57  ;;  %3993 = vmatpush1.bf16.msra.mxu1 %v5844_v58  ;;  %v5925_v57 = vld [vmem:[%s6882_s27 + $0x2b0] ss:$48 sps:$4 sm:$0xff]   ;;  %v5928_v58 = vld [vmem:[%s6882_s27 + $0x2b8] ss:$48 sps:$4 sm:$0xff]  }
 0x119   : > { %3865 = vmatprep.subr.bf16.mxu0 %v5849_v59  ;;  %3994 = vmatprep.subr.bf16.mxu1 %v5852_v60  ;;  %v5933_v59 = vld [vmem:[%s6882_s27 + $0x314] ss:$48 sps:$4 sm:$0xff]   ;;  %v5936_v60 = vld [vmem:[%s6882_s27 + $0x31c] ss:$48 sps:$4 sm:$0xff]  }
 0x11c   : > { %3866 = vmatpush1.bf16.msra.mxu0 %v5847_v61  ;;  %3995 = vmatpush1.bf16.msra.mxu1 %v5850_v62  ;;  %v5931_v61 = vld [vmem:[%s6882_s27 + $0x310] ss:$48 sps:$4 sm:$0xff]   ;;  %v5934_v62 = vld [vmem:[%s6882_s27 + $0x318] ss:$48 sps:$4 sm:$0xff]  }
 0x11d   : > { %3867 = vmatprep.subr.bf16.mxu0 %v5855_v63  ;;  %3996 = vmatprep.subr.bf16.mxu1 %v5858_v0  ;;  %v5939_v63 = vld [vmem:[%s6882_s27 + $0x374] ss:$48 sps:$4 sm:$0xff]   ;;  %v5942_v0 = vld [vmem:[%s6882_s27 + $0x37c] ss:$48 sps:$4 sm:$0xff]  }
 0x120   : > { %3868 = vmatpush1.bf16.msra.mxu0 %v5853_v1  ;;  %3997 = vmatpush1.bf16.msra.mxu1 %v5856_v2  ;;  %v5937_v1 = vld [vmem:[%s6882_s27 + $0x370] ss:$48 sps:$4 sm:$0xff]   ;;  %v5940_v2 = vld [vmem:[%s6882_s27 + $0x378] ss:$48 sps:$4 sm:$0xff]  }
 0x121   : > { %3869 = vmatprep.subr.bf16.mxu0 %v5861_v3  ;;  %3998 = vmatprep.subr.bf16.mxu1 %v5864_v4  ;;  %v5945_v3 = vld [vmem:[%s6882_s27 + $0x3d4] ss:$48 sps:$4 sm:$0xff]   ;;  %v5948_v4 = vld [vmem:[%s6882_s27 + $0x3dc] ss:$48 sps:$4 sm:$0xff]  }
 0x124   : > { %3870 = vmatpush1.bf16.msra.mxu0 %v5859_v5  ;;  %3999 = vmatpush1.bf16.msra.mxu1 %v5862_v6  ;;  %v5943_v5 = vld [vmem:[%s6882_s27 + $0x3d0] ss:$48 sps:$4 sm:$0xff]   ;;  %v5946_v6 = vld [vmem:[%s6882_s27 + $0x3d8] ss:$48 sps:$4 sm:$0xff]  }
 0x125   : > { %3871 = vmatprep.subr.bf16.mxu0 %v5867_v7  ;;  %4000 = vmatprep.subr.bf16.mxu1 %v5870_v8  ;;  %v5951_v7 = vld [vmem:[%s6882_s27 + $0x434] ss:$48 sps:$4 sm:$0xff]   ;;  %v5954_v8 = vld [vmem:[%s6882_s27 + $0x43c] ss:$48 sps:$4 sm:$0xff]  }
 0x128   : > { %3872 = vmatpush1.bf16.msra.mxu0 %v5865_v10  ;;  %4001 = vmatpush1.bf16.msra.mxu1 %v5868_v11  ;;  %v5949_v10 = vld [vmem:[%s6882_s27 + $0x430] ss:$48 sps:$4 sm:$0xff]   ;;  %v5952_v11 = vld [vmem:[%s6882_s27 + $0x438] ss:$48 sps:$4 sm:$0xff]  }
 0x129   : > { %3873 = vmatprep.subr.bf16.mxu0 %v5873_v12  ;;  %4002 = vmatprep.subr.bf16.mxu1 %v5876_v13  ;;  %v5957_v12 = vld [vmem:[%s6882_s27 + $0x494] ss:$48 sps:$4 sm:$0xff]   ;;  %v5960_v13 = vld [vmem:[%s6882_s27 + $0x49c] ss:$48 sps:$4 sm:$0xff]  }
 0x12c   : > { %3874 = vmatpush1.bf16.msra.mxu0 %v5871_v14  ;;  %4003 = vmatpush1.bf16.msra.mxu1 %v5874_v15  ;;  %v5955_v14 = vld [vmem:[%s6882_s27 + $0x490] ss:$48 sps:$4 sm:$0xff]   ;;  %v5958_v15 = vld [vmem:[%s6882_s27 + $0x498] ss:$48 sps:$4 sm:$0xff]  }
 0x12d   : > { %3875 = vmatprep.subr.bf16.mxu0 %v5879_v16  ;;  %4004 = vmatprep.subr.bf16.mxu1 %v5882_v18  ;;  %v5963_v16 = vld [vmem:[%s6882_s27 + $0x4f4] ss:$48 sps:$4 sm:$0xff]   ;;  %v5966_v18 = vld [vmem:[%s6882_s27 + $0x4fc] ss:$48 sps:$4 sm:$0xff]  }
 0x130   : > { %3876 = vmatpush1.bf16.msra.mxu0 %v5877_v19  ;;  %4005 = vmatpush1.bf16.msra.mxu1 %v5880_v20  ;;  %v5961_v19 = vld [vmem:[%s6882_s27 + $0x4f0] ss:$48 sps:$4 sm:$0xff]   ;;  %v5964_v20 = vld [vmem:[%s6882_s27 + $0x4f8] ss:$48 sps:$4 sm:$0xff]  }
 0x131   : > { %4017 = vmatprep.subr.bf16.mxu0 %v5885_v23  ;;  %4146 = vmatprep.subr.bf16.mxu1 %v5888_v24  ;;  %v5967_v23 = vld [vmem:[%s6882_s27 + $0x550] ss:$48 sps:$4 sm:$0xff]   ;;  %v5970_v24 = vld [vmem:[%s6882_s27 + $0x558] ss:$48 sps:$4 sm:$0xff]  }
 0x133   : > { %3878 = vmatmul.mubr.bf16.vlgmr.msra.gmra.mrb[0].mxu0 %v7106_v26  ;;  %4007 = vmatmul.mubr.bf16.vlgmr.msra.gmra.mrb[0].mxu1 %v7106_v26 }
 0x134   : > { %4018 = vmatpush1.bf16.msra.mxu0 %v5883_v27  ;;  %4147 = vmatpush1.bf16.msra.mxu1 %v5886_v28  ;;  %v5975_v27 = vld [vmem:[%s6882_s27 + $0x5b4] ss:$48 sps:$4 sm:$0xff]   ;;  %v5978_v28 = vld [vmem:[%s6882_s27 + $0x5bc] ss:$48 sps:$4 sm:$0xff]  }
 0x135   : > { %4019 = vmatprep.subr.bf16.mxu0 %v5891_v29  ;;  %4148 = vmatprep.subr.bf16.mxu1 %v5894_v30  ;;  %v5973_v29 = vld [vmem:[%s6882_s27 + $0x5b0] ss:$48 sps:$4 sm:$0xff]   ;;  %v5976_v30 = vld [vmem:[%s6882_s27 + $0x5b8] ss:$48 sps:$4 sm:$0xff]  }
 0x136   : > { %4049 = vmatprep.mubr.bf16.mxu0 %v6940_v50  ;;  %4178 = vmatprep.mubr.bf16.mxu1 %v6940_v50 }
 0x138   : > { %4020 = vmatpush1.bf16.msra.mxu0 %v5889_v31  ;;  %4149 = vmatpush1.bf16.msra.mxu1 %v5892_v32  ;;  %v5981_v31 = vld [vmem:[%s6882_s27 + $0x614] ss:$48 sps:$4 sm:$0xff]   ;;  %v5984_v32 = vld [vmem:[%s6882_s27 + $0x61c] ss:$48 sps:$4 sm:$0xff]  }
 0x139   : > { %4021 = vmatprep.subr.bf16.mxu0 %v5897_v33  ;;  %4150 = vmatprep.subr.bf16.mxu1 %v5900_v34  ;;  %v5979_v33 = vld [vmem:[%s6882_s27 + $0x610] ss:$48 sps:$4 sm:$0xff]   ;;  %v5982_v34 = vld [vmem:[%s6882_s27 + $0x618] ss:$48 sps:$4 sm:$0xff]  }
 0x13c   : > { %4022 = vmatpush1.bf16.msra.mxu0 %v5895_v35  ;;  %4151 = vmatpush1.bf16.msra.mxu1 %v5898_v37  ;;  %v5987_v35 = vld [vmem:[%s6882_s27 + $0x674] ss:$48 sps:$4 sm:$0xff]   ;;  %v5990_v37 = vld [vmem:[%s6882_s27 + $0x67c] ss:$48 sps:$4 sm:$0xff]  }
 0x13d   : > { %4023 = vmatprep.subr.bf16.mxu0 %v5903_v38  ;;  %4152 = vmatprep.subr.bf16.mxu1 %v5906_v39  ;;  %v5985_v38 = vld [vmem:[%s6882_s27 + $0x670] ss:$48 sps:$4 sm:$0xff]   ;;  %v5988_v39 = vld [vmem:[%s6882_s27 + $0x678] ss:$48 sps:$4 sm:$0xff]  }
 0x140   : > { %4024 = vmatpush1.bf16.msra.mxu0 %v5901_v40  ;;  %4153 = vmatpush1.bf16.msra.mxu1 %v5904_v41  ;;  %v5993_v40 = vld [vmem:[%s6882_s27 + $0x6d4] ss:$48 sps:$4 sm:$0xff]   ;;  %v5996_v41 = vld [vmem:[%s6882_s27 + $0x6dc] ss:$48 sps:$4 sm:$0xff]  }
 0x141   : > { %4025 = vmatprep.subr.bf16.mxu0 %v5909_v42  ;;  %4154 = vmatprep.subr.bf16.mxu1 %v5912_v43  ;;  %v5991_v42 = vld [vmem:[%s6882_s27 + $0x6d0] ss:$48 sps:$4 sm:$0xff]   ;;  %v5994_v43 = vld [vmem:[%s6882_s27 + $0x6d8] ss:$48 sps:$4 sm:$0xff]  }
 0x144   : > { %4026 = vmatpush1.bf16.msra.mxu0 %v5907_v44  ;;  %4155 = vmatpush1.bf16.msra.mxu1 %v5910_v45  ;;  %v5999_v44 = vld [vmem:[%s6882_s27 + $0x734] ss:$48 sps:$4 sm:$0xff]   ;;  %v6002_v45 = vld [vmem:[%s6882_s27 + $0x73c] ss:$48 sps:$4 sm:$0xff]  }
 0x145   : > { %4027 = vmatprep.subr.bf16.mxu0 %v5915_v46  ;;  %4156 = vmatprep.subr.bf16.mxu1 %v5918_v47  ;;  %v5997_v46 = vld [vmem:[%s6882_s27 + $0x730] ss:$48 sps:$4 sm:$0xff]   ;;  %v6000_v47 = vld [vmem:[%s6882_s27 + $0x738] ss:$48 sps:$4 sm:$0xff]  }
 0x148   : > { %4028 = vmatpush1.bf16.msra.mxu0 %v5913_v48  ;;  %4157 = vmatpush1.bf16.msra.mxu1 %v5916_v49  ;;  %v6005_v48 = vld [vmem:[%s6882_s27 + $0x794] ss:$48 sps:$4 sm:$0xff]   ;;  %v6008_v49 = vld [vmem:[%s6882_s27 + $0x79c] ss:$48 sps:$4 sm:$0xff]  }
 0x149   : > { %4029 = vmatprep.subr.bf16.mxu0 %v5921_v51  ;;  %4158 = vmatprep.subr.bf16.mxu1 %v5924_v52  ;;  %v6003_v51 = vld [vmem:[%s6882_s27 + $0x790] ss:$48 sps:$4 sm:$0xff]   ;;  %v6006_v52 = vld [vmem:[%s6882_s27 + $0x798] ss:$48 sps:$4 sm:$0xff]  }
 0x14c   : > { %4030 = vmatpush1.bf16.msra.mxu0 %v5919_v53  ;;  %4159 = vmatpush1.bf16.msra.mxu1 %v5922_v54  ;;  %v6011_v53 = vld [vmem:[%s6882_s27 + $0x7f4] ss:$48 sps:$4 sm:$0xff]   ;;  %v6014_v54 = vld [vmem:[%s6882_s27 + $0x7fc] ss:$48 sps:$4 sm:$0xff]  }
 0x14d   : > { %4031 = vmatprep.subr.bf16.mxu0 %v5927_v55  ;;  %4160 = vmatprep.subr.bf16.mxu1 %v5930_v56  ;;  %v6009_v55 = vld [vmem:[%s6882_s27 + $0x7f0] ss:$48 sps:$4 sm:$0xff]   ;;  %v6012_v56 = vld [vmem:[%s6882_s27 + $0x7f8] ss:$48 sps:$4 sm:$0xff]  }
 0x150   : > { %4032 = vmatpush1.bf16.msra.mxu0 %v5925_v57  ;;  %4161 = vmatpush1.bf16.msra.mxu1 %v5928_v58  ;;  %v6017_v57 = vld [vmem:[%s6882_s27 + $0x854] ss:$48 sps:$4 sm:$0xff]   ;;  %v6020_v58 = vld [vmem:[%s6882_s27 + $0x85c] ss:$48 sps:$4 sm:$0xff]  }
 0x151   : > { %4033 = vmatprep.subr.bf16.mxu0 %v5933_v59  ;;  %4162 = vmatprep.subr.bf16.mxu1 %v5936_v60  ;;  %v6015_v59 = vld [vmem:[%s6882_s27 + $0x850] ss:$48 sps:$4 sm:$0xff]   ;;  %v6018_v60 = vld [vmem:[%s6882_s27 + $0x858] ss:$48 sps:$4 sm:$0xff]  }
 0x154   : > { %4034 = vmatpush1.bf16.msra.mxu0 %v5931_v61  ;;  %4163 = vmatpush1.bf16.msra.mxu1 %v5934_v62  ;;  %v6023_v61 = vld [vmem:[%s6882_s27 + $0x8b4] ss:$48 sps:$4 sm:$0xff]   ;;  %v6026_v62 = vld [vmem:[%s6882_s27 + $0x8bc] ss:$48 sps:$4 sm:$0xff]  }
 0x155   : > { %4035 = vmatprep.subr.bf16.mxu0 %v5939_v63  ;;  %4164 = vmatprep.subr.bf16.mxu1 %v5942_v0  ;;  %v6021_v63 = vld [vmem:[%s6882_s27 + $0x8b0] ss:$48 sps:$4 sm:$0xff]   ;;  %v6024_v0 = vld [vmem:[%s6882_s27 + $0x8b8] ss:$48 sps:$4 sm:$0xff]  }
 0x158   : > { %4036 = vmatpush1.bf16.msra.mxu0 %v5937_v1  ;;  %4165 = vmatpush1.bf16.msra.mxu1 %v5940_v2  ;;  %v6029_v1 = vld [vmem:[%s6882_s27 + $0x914] ss:$48 sps:$4 sm:$0xff]   ;;  %v6032_v2 = vld [vmem:[%s6882_s27 + $0x91c] ss:$48 sps:$4 sm:$0xff]  }
 0x159   : > { %4037 = vmatprep.subr.bf16.mxu0 %v5945_v3  ;;  %4166 = vmatprep.subr.bf16.mxu1 %v5948_v4  ;;  %v6027_v3 = vld [vmem:[%s6882_s27 + $0x910] ss:$48 sps:$4 sm:$0xff]   ;;  %v6030_v4 = vld [vmem:[%s6882_s27 + $0x918] ss:$48 sps:$4 sm:$0xff]  }
 0x15c   : > { %4038 = vmatpush1.bf16.msra.mxu0 %v5943_v5  ;;  %4167 = vmatpush1.bf16.msra.mxu1 %v5946_v6  ;;  %v6035_v5 = vld [vmem:[%s6882_s27 + $0x974] ss:$48 sps:$4 sm:$0xff]   ;;  %v6038_v6 = vld [vmem:[%s6882_s27 + $0x97c] ss:$48 sps:$4 sm:$0xff]  }
 0x15d   : > { %4039 = vmatprep.subr.bf16.mxu0 %v5951_v7  ;;  %4168 = vmatprep.subr.bf16.mxu1 %v5954_v8  ;;  %v6033_v7 = vld [vmem:[%s6882_s27 + $0x970] ss:$48 sps:$4 sm:$0xff]   ;;  %v6036_v8 = vld [vmem:[%s6882_s27 + $0x978] ss:$48 sps:$4 sm:$0xff]  }
 0x160   : > { %4040 = vmatpush1.bf16.msra.mxu0 %v5949_v10  ;;  %4169 = vmatpush1.bf16.msra.mxu1 %v5952_v11  ;;  %v6041_v10 = vld [vmem:[%s6882_s27 + $0x9d4] ss:$48 sps:$4 sm:$0xff]   ;;  %v6044_v11 = vld [vmem:[%s6882_s27 + $0x9dc] ss:$48 sps:$4 sm:$0xff]  }
 0x161   : > { %4041 = vmatprep.subr.bf16.mxu0 %v5957_v12  ;;  %4170 = vmatprep.subr.bf16.mxu1 %v5960_v13  ;;  %v6039_v12 = vld [vmem:[%s6882_s27 + $0x9d0] ss:$48 sps:$4 sm:$0xff]   ;;  %v6042_v13 = vld [vmem:[%s6882_s27 + $0x9d8] ss:$48 sps:$4 sm:$0xff]  }
 0x164   : > { %4042 = vmatpush1.bf16.msra.mxu0 %v5955_v14  ;;  %4171 = vmatpush1.bf16.msra.mxu1 %v5958_v15  ;;  %v6047_v14 = vld [vmem:[%s6882_s27 + $0xa34] ss:$48 sps:$4 sm:$0xff]   ;;  %v6050_v15 = vld [vmem:[%s6882_s27 + $0xa3c] ss:$48 sps:$4 sm:$0xff]  }
 0x165   : > { %4043 = vmatprep.subr.bf16.mxu0 %v5963_v16  ;;  %4172 = vmatprep.subr.bf16.mxu1 %v5966_v18  ;;  %v6045_v16 = vld [vmem:[%s6882_s27 + $0xa30] ss:$48 sps:$4 sm:$0xff]   ;;  %v6048_v18 = vld [vmem:[%s6882_s27 + $0xa38] ss:$48 sps:$4 sm:$0xff]  }
 0x168   : > { %4044 = vmatpush1.bf16.msra.mxu0 %v5961_v19  ;;  %4173 = vmatpush1.bf16.msra.mxu1 %v5964_v20  ;;  %v6053_v19 = vld [vmem:[%s6882_s27 + $0xa94] ss:$48 sps:$4 sm:$0xff]   ;;  %v6056_v20 = vld [vmem:[%s6882_s27 + $0xa9c] ss:$48 sps:$4 sm:$0xff]  }
 0x169   : > { %4045 = vmatprep.subr.bf16.mxu0 %v5969_v21  ;;  %4174 = vmatprep.subr.bf16.mxu1 %v5972_v22  ;;  %v6051_v21 = vld [vmem:[%s6882_s27 + $0xa90] ss:$48 sps:$4 sm:$0xff]   ;;  %v6054_v22 = vld [vmem:[%s6882_s27 + $0xa98] ss:$48 sps:$4 sm:$0xff]  }
 0x16c   : > { %4046 = vmatpush1.bf16.msra.mxu0 %v5967_v23  ;;  %4175 = vmatpush1.bf16.msra.mxu1 %v5970_v24  ;;  %v6059_v23 = vld [vmem:[%s6882_s27 + $0xaf4] ss:$48 sps:$4 sm:$0xff]   ;;  %v6062_v24 = vld [vmem:[%s6882_s27 + $0xafc] ss:$48 sps:$4 sm:$0xff]  }
 0x16d   : > { %4047 = vmatprep.subr.bf16.mxu0 %v5975_v27  ;;  %4176 = vmatprep.subr.bf16.mxu1 %v5978_v28  ;;  %v6057_v27 = vld [vmem:[%s6882_s27 + $0xaf0] ss:$48 sps:$4 sm:$0xff]   ;;  %v6060_v28 = vld [vmem:[%s6882_s27 + $0xaf8] ss:$48 sps:$4 sm:$0xff]  }
 0x170   : > { %4048 = vmatpush1.bf16.msra.mxu0 %v5973_v29  ;;  %4177 = vmatpush1.bf16.msra.mxu1 %v5976_v30  ;;  %v6065_v29 = vld [vmem:[%s6882_s27 + $0xb54] ss:$48 sps:$4 sm:$0xff]   ;;  %v6068_v30 = vld [vmem:[%s6882_s27 + $0xb5c] ss:$48 sps:$4 sm:$0xff]  }
 0x171   : > { %4060 = vmatprep.subr.bf16.mxu0 %v5981_v31  ;;  %4189 = vmatprep.subr.bf16.mxu1 %v5984_v32  ;;  %v6063_v31 = vld [vmem:[%s6882_s27 + $0xb50] ss:$48 sps:$4 sm:$0xff]   ;;  %v6066_v32 = vld [vmem:[%s6882_s27 + $0xb58] ss:$48 sps:$4 sm:$0xff]  }
 0x173   : > { %4050 = vmatmul.mubr.bf16.vlgmr.msra.gmra.mrb[4].mxu0 %v6964_v9  ;;  %4179 = vmatmul.mubr.bf16.vlgmr.msra.gmra.mrb[4].mxu1 %v6964_v9 }
 0x174   : > { %4061 = vmatpush1.bf16.msra.mxu0 %v5979_v33  ;;  %4190 = vmatpush1.bf16.msra.mxu1 %v5982_v34  ;;  %v6071_v33 = vld [vmem:[%s6882_s27 + $0xbb4] ss:$48 sps:$4 sm:$0xff]   ;;  %v6074_v34 = vld [vmem:[%s6882_s27 + $0xbbc] ss:$48 sps:$4 sm:$0xff]  }
 0x175   : > { %4062 = vmatprep.subr.bf16.mxu0 %v5987_v35  ;;  %4191 = vmatprep.subr.bf16.mxu1 %v5990_v37  ;;  %v6069_v35 = vld [vmem:[%s6882_s27 + $0xbb0] ss:$48 sps:$4 sm:$0xff]   ;;  %v6072_v37 = vld [vmem:[%s6882_s27 + $0xbb8] ss:$48 sps:$4 sm:$0xff]  }
 0x176   : > { %4092 = vmatprep.mubr.bf16.mxu0 %v6992_v36  ;;  %4221 = vmatprep.mubr.bf16.mxu1 %v6992_v36 }
 0x178   : > { %4063 = vmatpush1.bf16.msra.mxu0 %v5985_v38  ;;  %4192 = vmatpush1.bf16.msra.mxu1 %v5988_v39  ;;  %v6077_v38 = vld [vmem:[%s6882_s27 + $0xc14] ss:$48 sps:$4 sm:$0xff]   ;;  %v6080_v39 = vld [vmem:[%s6882_s27 + $0xc1c] ss:$48 sps:$4 sm:$0xff]  }
 0x179   : > { %4064 = vmatprep.subr.bf16.mxu0 %v5993_v40  ;;  %4193 = vmatprep.subr.bf16.mxu1 %v5996_v41  ;;  %v6075_v40 = vld [vmem:[%s6882_s27 + $0xc10] ss:$48 sps:$4 sm:$0xff]   ;;  %v6078_v41 = vld [vmem:[%s6882_s27 + $0xc18] ss:$48 sps:$4 sm:$0xff]  }
 0x17c   : > { %4065 = vmatpush1.bf16.msra.mxu0 %v5991_v42  ;;  %4194 = vmatpush1.bf16.msra.mxu1 %v5994_v43  ;;  %v6083_v42 = vld [vmem:[%s6882_s27 + $0xc74] ss:$48 sps:$4 sm:$0xff]   ;;  %v6086_v43 = vld [vmem:[%s6882_s27 + $0xc7c] ss:$48 sps:$4 sm:$0xff]  }
 0x17d   : > { %4066 = vmatprep.subr.bf16.mxu0 %v5999_v44  ;;  %4195 = vmatprep.subr.bf16.mxu1 %v6002_v45  ;;  %v6081_v44 = vld [vmem:[%s6882_s27 + $0xc70] ss:$48 sps:$4 sm:$0xff]   ;;  %v6084_v45 = vld [vmem:[%s6882_s27 + $0xc78] ss:$48 sps:$4 sm:$0xff]  }
 0x180   : > { %4067 = vmatpush1.bf16.msra.mxu0 %v5997_v46  ;;  %4196 = vmatpush1.bf16.msra.mxu1 %v6000_v47  ;;  %v6089_v46 = vld [vmem:[%s6882_s27 + $0xcd4] ss:$48 sps:$4 sm:$0xff]   ;;  %v6092_v47 = vld [vmem:[%s6882_s27 + $0xcdc] ss:$48 sps:$4 sm:$0xff]  }
 0x181   : > { %4068 = vmatprep.subr.bf16.mxu0 %v6005_v48  ;;  %4197 = vmatprep.subr.bf16.mxu1 %v6008_v49  ;;  %v6087_v48 = vld [vmem:[%s6882_s27 + $0xcd0] ss:$48 sps:$4 sm:$0xff]   ;;  %v6090_v49 = vld [vmem:[%s6882_s27 + $0xcd8] ss:$48 sps:$4 sm:$0xff]  }
 0x184   : > { %4069 = vmatpush1.bf16.msra.mxu0 %v6003_v51  ;;  %4198 = vmatpush1.bf16.msra.mxu1 %v6006_v52  ;;  %v6095_v51 = vld [vmem:[%s6882_s27 + $0xd34] ss:$48 sps:$4 sm:$0xff]   ;;  %v6098_v52 = vld [vmem:[%s6882_s27 + $0xd3c] ss:$48 sps:$4 sm:$0xff]  }
 0x185   : > { %4070 = vmatprep.subr.bf16.mxu0 %v6011_v53  ;;  %4199 = vmatprep.subr.bf16.mxu1 %v6014_v54  ;;  %v6093_v53 = vld [vmem:[%s6882_s27 + $0xd30] ss:$48 sps:$4 sm:$0xff]   ;;  %v6096_v54 = vld [vmem:[%s6882_s27 + $0xd38] ss:$48 sps:$4 sm:$0xff]  }
 0x188   : > { %4071 = vmatpush1.bf16.msra.mxu0 %v6009_v55  ;;  %4200 = vmatpush1.bf16.msra.mxu1 %v6012_v56  ;;  %v6101_v55 = vld [vmem:[%s6882_s27 + $0xd94] ss:$48 sps:$4 sm:$0xff]   ;;  %v6104_v56 = vld [vmem:[%s6882_s27 + $0xd9c] ss:$48 sps:$4 sm:$0xff]  }
 0x189   : > { %4072 = vmatprep.subr.bf16.mxu0 %v6017_v57  ;;  %4201 = vmatprep.subr.bf16.mxu1 %v6020_v58  ;;  %v6099_v57 = vld [vmem:[%s6882_s27 + $0xd90] ss:$48 sps:$4 sm:$0xff]   ;;  %v6102_v58 = vld [vmem:[%s6882_s27 + $0xd98] ss:$48 sps:$4 sm:$0xff]  }
 0x18c   : > { %4073 = vmatpush1.bf16.msra.mxu0 %v6015_v59  ;;  %4202 = vmatpush1.bf16.msra.mxu1 %v6018_v60  ;;  %v6107_v59 = vld [vmem:[%s6882_s27 + $0xdf4] ss:$48 sps:$4 sm:$0xff]   ;;  %v6110_v60 = vld [vmem:[%s6882_s27 + $0xdfc] ss:$48 sps:$4 sm:$0xff]  }
 0x18d   : > { %4074 = vmatprep.subr.bf16.mxu0 %v6023_v61  ;;  %4203 = vmatprep.subr.bf16.mxu1 %v6026_v62  ;;  %v6105_v61 = vld [vmem:[%s6882_s27 + $0xdf0] ss:$48 sps:$4 sm:$0xff]   ;;  %v6108_v62 = vld [vmem:[%s6882_s27 + $0xdf8] ss:$48 sps:$4 sm:$0xff]  }
 0x190   : > { %4075 = vmatpush1.bf16.msra.mxu0 %v6021_v63  ;;  %4204 = vmatpush1.bf16.msra.mxu1 %v6024_v0  ;;  %v6113_v63 = vld [vmem:[%s6882_s27 + $0xe54] ss:$48 sps:$4 sm:$0xff]   ;;  %v6116_v0 = vld [vmem:[%s6882_s27 + $0xe5c] ss:$48 sps:$4 sm:$0xff]  }
 0x191   : > { %4076 = vmatprep.subr.bf16.mxu0 %v6029_v1  ;;  %4205 = vmatprep.subr.bf16.mxu1 %v6032_v2  ;;  %v6111_v1 = vld [vmem:[%s6882_s27 + $0xe50] ss:$48 sps:$4 sm:$0xff]   ;;  %v6114_v2 = vld [vmem:[%s6882_s27 + $0xe58] ss:$48 sps:$4 sm:$0xff]  }
 0x194   : > { %4077 = vmatpush1.bf16.msra.mxu0 %v6027_v3  ;;  %4206 = vmatpush1.bf16.msra.mxu1 %v6030_v4  ;;  %v6119_v3 = vld [vmem:[%s6882_s27 + $0xeb4] ss:$48 sps:$4 sm:$0xff]   ;;  %v6122_v4 = vld [vmem:[%s6882_s27 + $0xebc] ss:$48 sps:$4 sm:$0xff]  }
 0x195   : > { %4078 = vmatprep.subr.bf16.mxu0 %v6035_v5  ;;  %4207 = vmatprep.subr.bf16.mxu1 %v6038_v6  ;;  %v6117_v5 = vld [vmem:[%s6882_s27 + $0xeb0] ss:$48 sps:$4 sm:$0xff]   ;;  %v6120_v6 = vld [vmem:[%s6882_s27 + $0xeb8] ss:$48 sps:$4 sm:$0xff]  }
 0x198   : > { %4079 = vmatpush1.bf16.msra.mxu0 %v6033_v7  ;;  %4208 = vmatpush1.bf16.msra.mxu1 %v6036_v8  ;;  %v6125_v7 = vld [vmem:[%s6882_s27 + $0xf14] ss:$48 sps:$4 sm:$0xff]   ;;  %v6128_v8 = vld [vmem:[%s6882_s27 + $0xf1c] ss:$48 sps:$4 sm:$0xff]  }
 0x199   : > { %4080 = vmatprep.subr.bf16.mxu0 %v6041_v10  ;;  %4209 = vmatprep.subr.bf16.mxu1 %v6044_v11  ;;  %v6123_v10 = vld [vmem:[%s6882_s27 + $0xf10] ss:$48 sps:$4 sm:$0xff]   ;;  %v6126_v11 = vld [vmem:[%s6882_s27 + $0xf18] ss:$48 sps:$4 sm:$0xff]  }
 0x19c   : > { %4081 = vmatpush1.bf16.msra.mxu0 %v6039_v12  ;;  %4210 = vmatpush1.bf16.msra.mxu1 %v6042_v13  ;;  %v6131_v12 = vld [vmem:[%s6882_s27 + $0xf74] ss:$48 sps:$4 sm:$0xff]   ;;  %v6134_v13 = vld [vmem:[%s6882_s27 + $0xf7c] ss:$48 sps:$4 sm:$0xff]  }
 0x19d   : > { %4082 = vmatprep.subr.bf16.mxu0 %v6047_v14  ;;  %4211 = vmatprep.subr.bf16.mxu1 %v6050_v15  ;;  %v6129_v14 = vld [vmem:[%s6882_s27 + $0xf70] ss:$48 sps:$4 sm:$0xff]   ;;  %v6132_v15 = vld [vmem:[%s6882_s27 + $0xf78] ss:$48 sps:$4 sm:$0xff]  }
 0x1a0   : > { %4083 = vmatpush1.bf16.msra.mxu0 %v6045_v16  ;;  %4212 = vmatpush1.bf16.msra.mxu1 %v6048_v18  ;;  %v6137_v16 = vld [vmem:[%s6882_s27 + $0xfd4] ss:$48 sps:$4 sm:$0xff]   ;;  %v6140_v18 = vld [vmem:[%s6882_s27 + $0xfdc] ss:$48 sps:$4 sm:$0xff]  }
 0x1a1   : > { %4084 = vmatprep.subr.bf16.mxu0 %v6053_v19  ;;  %4213 = vmatprep.subr.bf16.mxu1 %v6056_v20  ;;  %v6135_v19 = vld [vmem:[%s6882_s27 + $0xfd0] ss:$48 sps:$4 sm:$0xff]   ;;  %v6138_v20 = vld [vmem:[%s6882_s27 + $0xfd8] ss:$48 sps:$4 sm:$0xff]  }
 0x1a4   : > { %4085 = vmatpush1.bf16.msra.mxu0 %v6051_v21  ;;  %4214 = vmatpush1.bf16.msra.mxu1 %v6054_v22  ;;  %v6143_v21 = vld [vmem:[%s6882_s27 + $0x1034] ss:$48 sps:$4 sm:$0xff]   ;;  %v6146_v22 = vld [vmem:[%s6882_s27 + $0x103c] ss:$48 sps:$4 sm:$0xff]  }
 0x1a5   : > { %4086 = vmatprep.subr.bf16.mxu0 %v6059_v23  ;;  %4215 = vmatprep.subr.bf16.mxu1 %v6062_v24  ;;  %v6141_v23 = vld [vmem:[%s6882_s27 + $0x1030] ss:$48 sps:$4 sm:$0xff]   ;;  %v6144_v24 = vld [vmem:[%s6882_s27 + $0x1038] ss:$48 sps:$4 sm:$0xff]  }
 0x1a8   : > { %4087 = vmatpush1.bf16.msra.mxu0 %v6057_v27  ;;  %4216 = vmatpush1.bf16.msra.mxu1 %v6060_v28  ;;  %v6149_v27 = vld [vmem:[%s6882_s27 + $0x1094] ss:$48 sps:$4 sm:$0xff]   ;;  %v6152_v28 = vld [vmem:[%s6882_s27 + $0x109c] ss:$48 sps:$4 sm:$0xff]  }
 0x1a9   : > { %4088 = vmatprep.subr.bf16.mxu0 %v6065_v29  ;;  %4217 = vmatprep.subr.bf16.mxu1 %v6068_v30  ;;  %v6147_v29 = vld [vmem:[%s6882_s27 + $0x1090] ss:$48 sps:$4 sm:$0xff]   ;;  %v6150_v30 = vld [vmem:[%s6882_s27 + $0x1098] ss:$48 sps:$4 sm:$0xff]  }
 0x1ac   : > { %4089 = vmatpush1.bf16.msra.mxu0 %v6063_v31  ;;  %4218 = vmatpush1.bf16.msra.mxu1 %v6066_v32  ;;  %v6155_v31 = vld [vmem:[%s6882_s27 + $0x10f4] ss:$48 sps:$4 sm:$0xff]   ;;  %v6158_v32 = vld [vmem:[%s6882_s27 + $0x10fc] ss:$48 sps:$4 sm:$0xff]  }
 0x1ad   : > { %4090 = vmatprep.subr.bf16.mxu0 %v6071_v33  ;;  %4219 = vmatprep.subr.bf16.mxu1 %v6074_v34  ;;  %v6153_v33 = vld [vmem:[%s6882_s27 + $0x10f0] ss:$48 sps:$4 sm:$0xff]   ;;  %v6156_v34 = vld [vmem:[%s6882_s27 + $0x10f8] ss:$48 sps:$4 sm:$0xff]  }
 0x1b0   : > { %4091 = vmatpush1.bf16.msra.mxu0 %v6069_v35  ;;  %4220 = vmatpush1.bf16.msra.mxu1 %v6072_v37  ;;  %v6161_v35 = vld [vmem:[%s6882_s27 + $0x1154] ss:$48 sps:$4 sm:$0xff]   ;;  %v6164_v37 = vld [vmem:[%s6882_s27 + $0x115c] ss:$48 sps:$4 sm:$0xff]  }
 0x1b1   : > { %4103 = vmatprep.subr.bf16.mxu0 %v6077_v38  ;;  %4232 = vmatprep.subr.bf16.mxu1 %v6080_v39  ;;  %v6159_v38 = vld [vmem:[%s6882_s27 + $0x1150] ss:$48 sps:$4 sm:$0xff]   ;;  %v6162_v39 = vld [vmem:[%s6882_s27 + $0x1158] ss:$48 sps:$4 sm:$0xff]  }
 0x1b3   : > { %4093 = vmatmul.mubr.bf16.vlgmr.msra.gmra.mrb[4].mxu0 %v7036_v17  ;;  %4222 = vmatmul.mubr.bf16.vlgmr.msra.gmra.mrb[4].mxu1 %v7036_v17 }
 0x1b4   : > { %4104 = vmatpush1.bf16.msra.mxu0 %v6075_v40  ;;  %4233 = vmatpush1.bf16.msra.mxu1 %v6078_v41  ;;  %v6167_v40 = vld [vmem:[%s6882_s27 + $0x11b4] ss:$48 sps:$4 sm:$0xff]   ;;  %v6170_v41 = vld [vmem:[%s6882_s27 + $0x11bc] ss:$48 sps:$4 sm:$0xff]  }
 0x1b5   : > { %4105 = vmatprep.subr.bf16.mxu0 %v6083_v42  ;;  %4234 = vmatprep.subr.bf16.mxu1 %v6086_v43  ;;  %v6165_v42 = vld [vmem:[%s6882_s27 + $0x11b0] ss:$48 sps:$4 sm:$0xff]   ;;  %v6168_v43 = vld [vmem:[%s6882_s27 + $0x11b8] ss:$48 sps:$4 sm:$0xff]  }
 0x1b6   : > { %4135 = vmatprep.mubr.bf16.mxu0 %v7045_v25  ;;  %4264 = vmatprep.mubr.bf16.mxu1 %v7045_v25 }
 0x1b8   : > { %4106 = vmatpush1.bf16.msra.mxu0 %v6081_v44  ;;  %4235 = vmatpush1.bf16.msra.mxu1 %v6084_v45  ;;  %v6173_v44 = vld [vmem:[%s6882_s27 + $0x24] ss:$48 sps:$4 sm:$0xff]   ;;  %v6176_v45 = vld [vmem:[%s6882_s27 + $0x2c] ss:$48 sps:$4 sm:$0xff]  }
 0x1b9   : > { %4107 = vmatprep.subr.bf16.mxu0 %v6089_v46  ;;  %4236 = vmatprep.subr.bf16.mxu1 %v6092_v47  ;;  %v6171_v46 = vld [vmem:[%s6882_s27 + $0x20] ss:$48 sps:$4 sm:$0xff]   ;;  %v6174_v47 = vld [vmem:[%s6882_s27 + $0x28] ss:$48 sps:$4 sm:$0xff]  }
 0x1bc   : > { %4108 = vmatpush1.bf16.msra.mxu0 %v6087_v48  ;;  %4237 = vmatpush1.bf16.msra.mxu1 %v6090_v49  ;;  %v6179_v48 = vld [vmem:[%s6882_s27 + $0x84] ss:$48 sps:$4 sm:$0xff]   ;;  %v6182_v49 = vld [vmem:[%s6882_s27 + $0x8c] ss:$48 sps:$4 sm:$0xff]  }
 0x1bd   : > { %4109 = vmatprep.subr.bf16.mxu0 %v6095_v51  ;;  %4238 = vmatprep.subr.bf16.mxu1 %v6098_v52  ;;  %v6177_v51 = vld [vmem:[%s6882_s27 + $0x80] ss:$48 sps:$4 sm:$0xff]   ;;  %v6180_v52 = vld [vmem:[%s6882_s27 + $0x88] ss:$48 sps:$4 sm:$0xff]  }
 0x1c0   : > { %4110 = vmatpush1.bf16.msra.mxu0 %v6093_v53  ;;  %4239 = vmatpush1.bf16.msra.mxu1 %v6096_v54  ;;  %v6185_v53 = vld [vmem:[%s6882_s27 + $0xe4] ss:$48 sps:$4 sm:$0xff]   ;;  %v6188_v54 = vld [vmem:[%s6882_s27 + $0xec] ss:$48 sps:$4 sm:$0xff]  }
 0x1c1   : > { %4111 = vmatprep.subr.bf16.mxu0 %v6101_v55  ;;  %4240 = vmatprep.subr.bf16.mxu1 %v6104_v56  ;;  %v819_v55 = vlaneseq  ;;  %v6183_v56 = vld [vmem:[%s6882_s27 + $0xe0] ss:$48 sps:$4 sm:$0xff]  }
 0x1c4   : > { %4112 = vmatpush1.bf16.msra.mxu0 %v6099_v57  ;;  %4241 = vmatpush1.bf16.msra.mxu1 %v6102_v58  ;;  %v6186_v57 = vld [vmem:[%s6882_s27 + $0xe8] ss:$48 sps:$4 sm:$0xff]   ;;  %v6191_v58 = vld [vmem:[%s6882_s27 + $0x144] ss:$48 sps:$4 sm:$0xff]  }
 0x1c5   : > { %4113 = vmatprep.subr.bf16.mxu0 %v6107_v59  ;;  %4242 = vmatprep.subr.bf16.mxu1 %v6110_v60  ;;  %v6194_v59 = vld [vmem:[%s6882_s27 + $0x14c] ss:$48 sps:$4 sm:$0xff]   ;;  %v7333_v60 = vshrl.u32 %v819_v55, 7  ;;  %v6219_v55 = vld [vmem:[%s6882_s27 + $0x320] ss:$48 sps:$4 sm:$0xff]  }
 0x1c8   : > { %4114 = vmatpush1.bf16.msra.mxu0 %v6105_v61  ;;  %4243 = vmatpush1.bf16.msra.mxu1 %v6108_v62  ;;  %v6192_v61 = vld [vmem:[%s6882_s27 + $0x148] ss:$48 sps:$4 sm:$0xff]   ;;  %v6197_v62 = vld [vmem:[%s6882_s27 + $0x1a4] ss:$48 sps:$4 sm:$0xff]  }
 0x1c9   : > { %4115 = vmatprep.subr.bf16.mxu0 %v6113_v63  ;;  %4244 = vmatprep.subr.bf16.mxu1 %v6116_v0  ;;  %v6200_v63 = vld [vmem:[%s6882_s27 + $0x1ac] ss:$48 sps:$4 sm:$0xff]   ;;  %v6195_v0 = vld [vmem:[%s6882_s27 + $0x1a0] ss:$48 sps:$4 sm:$0xff]  }
 0x1cc   : > { %4116 = vmatpush1.bf16.msra.mxu0 %v6111_v1  ;;  %4245 = vmatpush1.bf16.msra.mxu1 %v6114_v2  ;;  %v821_v1 = vsub.s32 0, %v7333_v60  ;;  %v829_v2 = vsub.s32 2, %v7333_v60 }
 0x1cd   : > { %4117 = vmatprep.subr.bf16.mxu0 %v6119_v3  ;;  %4246 = vmatprep.subr.bf16.mxu1 %v6122_v4  ;;  %v6198_v3 = vld [vmem:[%s6882_s27 + $0x1a8] ss:$48 sps:$4 sm:$0xff]   ;;  %v7346_v4 = vld [vmem:[%s814_s11] sm:$0xff] }
 0x1d0   : > { %4118 = vmatpush1.bf16.msra.mxu0 %v6117_v5  ;;  %4247 = vmatpush1.bf16.msra.mxu1 %v6120_v6  ;;  %v825_v5 = vsub.s32 1, %v7333_v60  ;;  %v833_v6 = vsub.s32 3, %v7333_v60 }
 0x1d1   : > { %4119 = vmatprep.subr.bf16.mxu0 %v6125_v7  ;;  %4248 = vmatprep.subr.bf16.mxu1 %v6128_v8  ;;  %v6203_v7 = vld [vmem:[%s6882_s27 + $0x204] ss:$48 sps:$4 sm:$0xff]   ;;  %v6206_v8 = vld [vmem:[%s6882_s27 + $0x20c] ss:$48 sps:$4 sm:$0xff]  }
 0x1d4   : > { %4120 = vmatpush1.bf16.msra.mxu0 %v6123_v10  ;;  %4249 = vmatpush1.bf16.msra.mxu1 %v6126_v11  ;;  %v822_v10 = vrot.slane %v7346_v4, %v821_v1  ;;  %v830_v11 = vrot.slane %v7346_v4, %v829_v2 }
 0x1d5   : > { %4121 = vmatprep.subr.bf16.mxu0 %v6131_v12  ;;  %4250 = vmatprep.subr.bf16.mxu1 %v6134_v13  ;;  %v826_v12 = vrot.slane %v7346_v4, %v825_v5  ;;  %v834_v13 = vrot.slane %v7346_v4, %v833_v6 }
 0x1d8   : > { %4122 = vmatpush1.bf16.msra.mxu0 %v6129_v14  ;;  %4251 = vmatpush1.bf16.msra.mxu1 %v6132_v15  ;;  %v6201_v14 = vld [vmem:[%s6882_s27 + $0x200] ss:$48 sps:$4 sm:$0xff]   ;;  %v6204_v15 = vld [vmem:[%s6882_s27 + $0x208] ss:$48 sps:$4 sm:$0xff]  }
 0x1d9   : > { %4123 = vmatprep.subr.bf16.mxu0 %v6137_v16  ;;  %4252 = vmatprep.subr.bf16.mxu1 %v6140_v18  ;;  %v6209_v16 = vld [vmem:[%s6882_s27 + $0x264] ss:$48 sps:$4 sm:$0xff]   ;;  %v6212_v18 = vld [vmem:[%s6882_s27 + $0x26c] ss:$48 sps:$4 sm:$0xff]  }
 0x1dc   : > { %4124 = vmatpush1.bf16.msra.mxu0 %v6135_v19  ;;  %4253 = vmatpush1.bf16.msra.mxu1 %v6138_v20 }
 0x1dd   : > { %4125 = vmatprep.subr.bf16.mxu0 %v6143_v21  ;;  %4254 = vmatprep.subr.bf16.mxu1 %v6146_v22 }
 0x1e0   : > { %4126 = vmatpush1.bf16.msra.mxu0 %v6141_v23  ;;  %4255 = vmatpush1.bf16.msra.mxu1 %v6144_v24 }
 0x1e1   : > { %4127 = vmatprep.subr.bf16.mxu0 %v6149_v27  ;;  %4256 = vmatprep.subr.bf16.mxu1 %v6152_v28  ;;  %v6207_v27 = vld [vmem:[%s6882_s27 + $0x260] ss:$48 sps:$4 sm:$0xff]  }
 0x1e4   : > { %4128 = vmatpush1.bf16.msra.mxu0 %v6147_v29  ;;  %4257 = vmatpush1.bf16.msra.mxu1 %v6150_v30 }
 0x1e5   : > { %4129 = vmatprep.subr.bf16.mxu0 %v6155_v31  ;;  %4258 = vmatprep.subr.bf16.mxu1 %v6158_v32  ;;  %v6210_v32 = vld [vmem:[%s6882_s27 + $0x268] ss:$48 sps:$4 sm:$0xff]  }
 0x1e8   : > { %4130 = vmatpush1.bf16.msra.mxu0 %v6153_v33  ;;  %4259 = vmatpush1.bf16.msra.mxu1 %v6156_v34  ;;  %v6215_v33 = vld [vmem:[%s6882_s27 + $0x2c4] ss:$48 sps:$4 sm:$0xff]  }
 0x1e9   : > { %4131 = vmatprep.subr.bf16.mxu0 %v6161_v35  ;;  %4260 = vmatprep.subr.bf16.mxu1 %v6164_v37  ;;  %v6218_v37 = vld [vmem:[%s6882_s27 + $0x2cc] ss:$48 sps:$4 sm:$0xff]  }
 0x1ec   : > { %4132 = vmatpush1.bf16.msra.mxu0 %v6159_v38  ;;  %4261 = vmatpush1.bf16.msra.mxu1 %v6162_v39 }
 0x1ed   : > { %4133 = vmatprep.subr.bf16.mxu0 %v6167_v40  ;;  %4262 = vmatprep.subr.bf16.mxu1 %v6170_v41 }
 0x1f0   : > { %4134 = vmatpush1.bf16.msra.mxu0 %v6165_v42  ;;  %4263 = vmatpush1.bf16.msra.mxu1 %v6168_v43 }
 0x1f1   : > { %4275 = vmatprep.subr.bf16.mxu0 %v6173_v44  ;;  %4404 = vmatprep.subr.bf16.mxu1 %v6176_v45 }
 0x1f3   : > { %4136 = vmatmul.mubr.bf16.vlgmr.msra.gmra.mrb[4].mxu0 %v7106_v26  ;;  %4265 = vmatmul.mubr.bf16.vlgmr.msra.gmra.mrb[4].mxu1 %v7106_v26 }
 0x1f4   : > { %4276 = vmatpush1.bf16.msra.mxu0 %v6171_v46  ;;  %4405 = vmatpush1.bf16.msra.mxu1 %v6174_v47  ;;  %v6213_v46 = vld [vmem:[%s6882_s27 + $0x2c0] ss:$48 sps:$4 sm:$0xff]   ;;  %v6216_v47 = vld [vmem:[%s6882_s27 + $0x2c8] ss:$48 sps:$4 sm:$0xff]  }
 0x1f5   : > { %4277 = vmatprep.subr.bf16.mxu0 %v6179_v48  ;;  %4406 = vmatprep.subr.bf16.mxu1 %v6182_v49  ;;  %v6221_v49 = vld [vmem:[%s6882_s27 + $0x324] ss:$48 sps:$4 sm:$0xff]  }
 0x1f6   : > { %4307 = vmatprep.mubr.bf16.mxu0 %v6940_v50  ;;  %4436 = vmatprep.mubr.bf16.mxu1 %v6940_v50  ;;  %v6189_v50 = vld [vmem:[%s6882_s27 + $0x140] ss:$48 sps:$4 sm:$0xff]  }
 0x1f8   : > { %4278 = vmatpush1.bf16.msra.mxu0 %v6177_v51  ;;  %4407 = vmatpush1.bf16.msra.mxu1 %v6180_v52  ;;  %v6224_v51 = vld [vmem:[%s6882_s27 + $0x32c] ss:$48 sps:$4 sm:$0xff]  }
 0x1f9   : > { %4279 = vmatprep.subr.bf16.mxu0 %v6185_v53  ;;  %4408 = vmatprep.subr.bf16.mxu1 %v6188_v54 }
 0x1fc   : > { %4280 = vmatpush1.bf16.msra.mxu0 %v6183_v56  ;;  %4409 = vmatpush1.bf16.msra.mxu1 %v6186_v57  ;;  %v6222_v56 = vld [vmem:[%s6882_s27 + $0x328] ss:$48 sps:$4 sm:$0xff]   ;;  %v6227_v57 = vld [vmem:[%s6882_s27 + $0x384] ss:$48 sps:$4 sm:$0xff]  }
 0x1fd   : > { %4281 = vmatprep.subr.bf16.mxu0 %v6191_v58  ;;  %4410 = vmatprep.subr.bf16.mxu1 %v6194_v59  ;;  %v6230_v58 = vld [vmem:[%s6882_s27 + $0x38c] ss:$48 sps:$4 sm:$0xff]   ;;  %v6225_v59 = vld [vmem:[%s6882_s27 + $0x380] ss:$48 sps:$4 sm:$0xff]  }
 0x200   : > { %4282 = vmatpush1.bf16.msra.mxu0 %v6189_v50  ;;  %4411 = vmatpush1.bf16.msra.mxu1 %v6192_v61  ;;  %v6228_v50 = vld [vmem:[%s6882_s27 + $0x388] ss:$48 sps:$4 sm:$0xff]  }
 0x201   : > { %4283 = vmatprep.subr.bf16.mxu0 %v6197_v62  ;;  %4412 = vmatprep.subr.bf16.mxu1 %v6200_v63  ;;  %v6233_v62 = vld [vmem:[%s6882_s27 + $0x3e4] ss:$48 sps:$4 sm:$0xff]   ;;  %v6236_v63 = vld [vmem:[%s6882_s27 + $0x3ec] ss:$48 sps:$4 sm:$0xff]  }
 0x204   : > { %4284 = vmatpush1.bf16.msra.mxu0 %v6195_v0  ;;  %4413 = vmatpush1.bf16.msra.mxu1 %v6198_v3 }
 0x205   : > { %4285 = vmatprep.subr.bf16.mxu0 %v6203_v7  ;;  %4414 = vmatprep.subr.bf16.mxu1 %v6206_v8 }
 0x206   : > { %v3879_v19 = vpop.f32.mrb[0].mxu0  ;;  %v4008_v20 = vpop.f32.mrb[0].mxu1 }
 0x207   : > { %v7368_v21 = vadd.f32 %v3879_v19, %v822_v10  ;;  %v7370_v22 = vadd.f32 %v4008_v20, %v830_v11  ;;  %v3881_v23 = vpop.f32.mrb[1].mxu0  ;;  %v4010_v24 = vpop.f32.mrb[1].mxu1  ;;  %v6239_v20 = vld [vmem:[%s6882_s27 + $0x444] ss:$48 sps:$4 sm:$0xff]  }
 0x208   : > { %v7373_v28 = vadd.f32 %v3881_v23, %v826_v12  ;;  %v7375_v29 = vadd.f32 %v4010_v24, %v834_v13  ;;  %v3883_v30 = vpop.f32.mrb[2].mxu0  ;;  %v4012_v31 = vpop.f32.mrb[2].mxu1  ;;  %4286 = vmatpush1.bf16.msra.mxu0 %v6201_v14  ;;  %4415 = vmatpush1.bf16.msra.mxu1 %v6204_v15 }
 0x209   : > { %v4557_v34 = vmul.f32 0.70710677, %v7368_v21  ;;  %v4559_v35 = vmul.f32 0.70710677, %v7370_v22  ;;  %4287 = vmatprep.subr.bf16.mxu0 %v6209_v16  ;;  %4416 = vmatprep.subr.bf16.mxu1 %v6212_v18  ;;  %v5449_v40 = vadd.f32 %v3883_v30, %v822_v10  ;;  %v5453_v41 = vadd.f32 %v4012_v31, %v830_v11  ;;  %v3885_v42 = vpop.f32.mrb[3].mxu0  ;;  %v4014_v43 = vpop.f32.mrb[3].mxu1 }
 0x20a   : > { %v4558_v38 = vmul.f32 0.70710677, %v7373_v28  ;;  %v4560_v39 = vmul.f32 0.70710677, %v7375_v29  ;;  %v7384_v44 = vadd.f32 %v3885_v42, %v826_v12  ;;  %v7386_v45 = vadd.f32 %v4014_v43, %v834_v13  ;;  %v6231_v12 = vld [vmem:[%s6882_s27 + $0x3e0] ss:$48 sps:$4 sm:$0xff]  }
 0x20b   : > { %6459 = verf.f32 %v4557_v34  ;;  %v4569_v48 = vmul.f32 0.70710677, %v5449_v40  ;;  %v4571_v52 = vmul.f32 0.70710677, %v5453_v41  ;;  %v4533_v3 = vmul.f32 0.5, %v7368_v21 }
 0x20c   : > { %6461 = verf.f32 %v4559_v35  ;;  %4288 = vmatpush1.bf16.msra.mxu0 %v6207_v27  ;;  %4417 = vmatpush1.bf16.msra.mxu1 %v6210_v32  ;;  %v4570_v53 = vmul.f32 0.70710677, %v7384_v44  ;;  %v4572_v54 = vmul.f32 0.70710677, %v7386_v45  ;;  %v4535_v10 = vmul.f32 0.5, %v7370_v22 }
 0x20d   : > { %6463 = verf.f32 %v4558_v38  ;;  %4289 = vmatprep.subr.bf16.mxu0 %v6215_v33  ;;  %4418 = vmatprep.subr.bf16.mxu1 %v6218_v37  ;;  %v6234_v13 = vld [vmem:[%s6882_s27 + $0x3e8] ss:$48 sps:$4 sm:$0xff]   ;;  %v4534_v16 = vmul.f32 0.5, %v7373_v28  ;;  %v4536_v19 = vmul.f32 0.5, %v7375_v29  ;;  %v4545_v22 = vmul.f32 0.5, %v5449_v40 }
 0x20e   : > { %6465 = verf.f32 %v4560_v39  ;;  %v4547_v27 = vmul.f32 0.5, %v5453_v41  ;;  %v6242_v30 = vld [vmem:[%s6882_s27 + $0x44c] ss:$48 sps:$4 sm:$0xff]   ;;  %v4546_v29 = vmul.f32 0.5, %v7384_v44  ;;  %v6237_v34 = vld [vmem:[%s6882_s27 + $0x440] ss:$48 sps:$4 sm:$0xff]  }
 0x20f   : > { %6467 = verf.f32 %v4569_v48  ;;  %v6240_v35 = vld [vmem:[%s6882_s27 + $0x448] ss:$48 sps:$4 sm:$0xff]   ;;  %v4548_v40 = vmul.f32 0.5, %v7386_v45  ;;  %v6245_v41 = vld [vmem:[%s6882_s27 + $0x4a4] ss:$48 sps:$4 sm:$0xff]  }
 0x210   : > { %6469 = verf.f32 %v4571_v52  ;;  %4290 = vmatpush1.bf16.msra.mxu0 %v6213_v46  ;;  %4419 = vmatpush1.bf16.msra.mxu1 %v6216_v47  ;;  %v6248_v43 = vld [vmem:[%s6882_s27 + $0x4ac] ss:$48 sps:$4 sm:$0xff]  }
 0x211   : > { %6471 = verf.f32 %v4570_v53  ;;  %4291 = vmatprep.subr.bf16.mxu0 %v6221_v49  ;;  %4420 = vmatprep.subr.bf16.mxu1 %v6224_v51 }
 0x212   : > { %6473 = verf.f32 %v4572_v54 }
 0x214   : > { %4292 = vmatpush1.bf16.msra.mxu0 %v6219_v55  ;;  %4421 = vmatpush1.bf16.msra.mxu1 %v6222_v56  ;;  %v6243_v55 = vld [vmem:[%s6882_s27 + $0x4a0] ss:$48 sps:$4 sm:$0xff]   ;;  %v6246_v56 = vld [vmem:[%s6882_s27 + $0x4a8] ss:$48 sps:$4 sm:$0xff]  }
 0x215   : > { %v6460_v61 = vpop.eup %6459  ;;  %4293 = vmatprep.subr.bf16.mxu0 %v6227_v57  ;;  %4422 = vmatprep.subr.bf16.mxu1 %v6230_v58 }
 0x216   : > { %v6462_v0 = vpop.eup %6461  ;;  %v4605_v7 = vadd.f32 1.0, %v6460_v61 }
 0x217   : > { %v6464_v8 = vpop.eup %6463  ;;  %v4607_v11 = vadd.f32 1.0, %v6462_v0 }
 0x218   : > { %v6466_v14 = vpop.eup %6465  ;;  %v4629_v15 = vmul.f32 %v4605_v7, %v4533_v3  ;;  %v4606_v18 = vadd.f32 1.0, %v6464_v8  ;;  %4294 = vmatpush1.bf16.msra.mxu0 %v6225_v59  ;;  %4423 = vmatpush1.bf16.msra.mxu1 %v6228_v50  ;;  %v6251_v50 = vld [vmem:[%s6882_s27 + $0x504] ss:$48 sps:$4 sm:$0xff]   ;;  %v6254_v3 = vld [vmem:[%s6882_s27 + $0x50c] ss:$48 sps:$4 sm:$0xff]  }
 0x219   : > { %v6468_v21 = vpop.eup %6467  ;;  %v4631_v23 = vmul.f32 %v4607_v11, %v4535_v10  ;;  %v4608_v24 = vadd.f32 1.0, %v6466_v14  ;;  %4295 = vmatprep.subr.bf16.mxu0 %v6233_v62  ;;  %4424 = vmatprep.subr.bf16.mxu1 %v6236_v63  ;;  %v6249_v11 = vld [vmem:[%s6882_s27 + $0x500] ss:$48 sps:$4 sm:$0xff]   ;;  %v6260_v14 = vld [vmem:[%s6882_s27 + $0x56c] ss:$48 sps:$4 sm:$0xff]  }
 0x21a   : > { %v6470_v31 = vpop.eup %6469  ;;  %v4653_v28 = vand.u32 2147483647, %v4629_v15  ;;  %v4630_v32 = vmul.f32 %v4606_v18, %v4534_v16  ;;  %v4617_v33 = vadd.f32 1.0, %v6468_v21  ;;  %v6255_v16 = vld [vmem:[%s6882_s27 + $0x560] ss:$48 sps:$4 sm:$0xff]  }
 0x21b   : > { %v6472_v37 = vpop.eup %6471  ;;  %v4655_v38 = vand.u32 2147483647, %v4631_v23  ;;  %v4632_v39 = vmul.f32 %v4608_v24, %v4536_v19  ;;  %v4619_v42 = vadd.f32 1.0, %v6470_v31  ;;  %v6258_v18 = vld [vmem:[%s6882_s27 + $0x568] ss:$48 sps:$4 sm:$0xff]  }
 0x21c   : > { %v6474_v46 = vpop.eup %6473  ;;  %vm4677_vm0 = vcmp.gt.f32.partialorder %v4653_v28, 0.1  ;;  %v4654_v47 = vand.u32 2147483647, %v4630_v32  ;;  %v4641_v48 = vmul.f32 %v4617_v33, %v4545_v22  ;;  %v4618_v49 = vadd.f32 1.0, %v6472_v37  ;;  %4296 = vmatpush1.bf16.msra.mxu0 %v6231_v12  ;;  %4425 = vmatpush1.bf16.msra.mxu1 %v6234_v13 }
 0x21d   : > { %v4701_v44 = vsel %vm4677_vm0, %v4629_v15, 0.0  ;;  %vm4679_vm1 = vcmp.gt.f32.partialorder %v4655_v38, 0.1  ;;  %v4656_v51 = vand.u32 2147483647, %v4632_v39  ;;  %v4643_v52 = vmul.f32 %v4619_v42, %v4547_v27  ;;  %4297 = vmatprep.subr.bf16.mxu0 %v6239_v20  ;;  %4426 = vmatprep.subr.bf16.mxu1 %v6242_v30 }
 0x21e   : > { %4725 = vst [vmem:[%s7419_s9] sm:$0xff] %v4701_v44  ;;  %v4703_v45 = vsel %vm4679_vm1, %v4631_v23, 0.0  ;;  %vm4678_vm2 = vcmp.gt.f32.partialorder %v4654_v47, 0.1  ;;  %v4665_v53 = vand.u32 2147483647, %v4641_v48  ;;  %v4642_v54 = vmul.f32 %v4618_v49, %v4546_v29 }
 0x21f   : > { %4727 = vst [vmem:[%s7419_s9 + $0x10] sm:$0xff] %v4703_v45  ;;  %v4702_v57 = vsel %vm4678_vm2, %v4630_v32, 0.0  ;;  %vm4680_vm3 = vcmp.gt.f32.partialorder %v4656_v51, 0.1  ;;  %v4667_v58 = vand.u32 2147483647, %v4643_v52 }
 0x220   : > { %v4620_v59 = vadd.f32 1.0, %v6474_v46  ;;  %4726 = vst [vmem:[%s7419_s9 + $0x8] sm:$0xff] %v4702_v57  ;;  %v4704_v61 = vsel %vm4680_vm3, %v4632_v39, 0.0  ;;  %vm4689_vm4 = vcmp.gt.f32.partialorder %v4665_v53, 0.1  ;;  %4298 = vmatpush1.bf16.msra.mxu0 %v6237_v34  ;;  %4427 = vmatpush1.bf16.msra.mxu1 %v6240_v35 }
 0x221   : > { %v4666_v62 = vand.u32 2147483647, %v4642_v54  ;;  %4728 = vst [vmem:[%s7419_s9 + $0x18] sm:$0xff] %v4704_v61  ;;  %v4713_v63 = vsel %vm4689_vm4, %v4641_v48, 0.0  ;;  %vm4691_vm5 = vcmp.gt.f32.partialorder %v4667_v58, 0.1  ;;  %4299 = vmatprep.subr.bf16.mxu0 %v6245_v41  ;;  %4428 = vmatprep.subr.bf16.mxu1 %v6248_v43 }
 0x222   : > { %v4644_v0 = vmul.f32 %v4620_v59, %v4548_v40  ;;  %4737 = vst [vmem:[%s7419_s9 + $0x60] sm:$0xff] %v4713_v63  ;;  %v4715_v7 = vsel %vm4691_vm5, %v4643_v52, 0.0  ;;  %v6252_v12 = vld [vmem:[%s6882_s27 + $0x508] ss:$48 sps:$4 sm:$0xff]   ;;  %v6257_v13 = vld [vmem:[%s6882_s27 + $0x564] ss:$48 sps:$4 sm:$0xff]  }
 0x223   : > { %vm4690_vm6 = vcmp.gt.f32.partialorder %v4666_v62, 0.1  ;;  %4739 = vst [vmem:[%s7419_s9 + $0x70] sm:$0xff] %v4715_v7  ;;  %v6263_v19 = vld [vmem:[%s6882_s27 + $0x5c4] ss:$48 sps:$4 sm:$0xff]  }
 0x224   : > { %v4714_v8 = vsel %vm4690_vm6, %v4642_v54, 0.0  ;;  %v4668_v10 = vand.u32 2147483647, %v4644_v0  ;;  %4300 = vmatpush1.bf16.msra.mxu0 %v6243_v55  ;;  %4429 = vmatpush1.bf16.msra.mxu1 %v6246_v56  ;;  %v6266_v20 = vld [vmem:[%s6882_s27 + $0x5cc] ss:$48 sps:$4 sm:$0xff]  }
 0x225   : > { %4738 = vst [vmem:[%s7419_s9 + $0x68] sm:$0xff] %v4714_v8  ;;  %4301 = vmatprep.subr.bf16.mxu0 %v6251_v50  ;;  %4430 = vmatprep.subr.bf16.mxu1 %v6254_v3  ;;  %v6261_v21 = vld [vmem:[%s6882_s27 + $0x5c0] ss:$48 sps:$4 sm:$0xff]   ;;  %v6264_v23 = vld [vmem:[%s6882_s27 + $0x5c8] ss:$48 sps:$4 sm:$0xff]  }
 0x226   : > { %vm4692_vm7 = vcmp.gt.f32.partialorder %v4668_v10, 0.1  ;;  %v6269_v24 = vld [vmem:[%s6882_s27 + $0x624] ss:$48 sps:$4 sm:$0xff]   ;;  %v6272_v22 = vld [vmem:[%s6882_s27 + $0x62c] ss:$48 sps:$4 sm:$0xff]  }
 0x227   : > { %v4716_v15 = vsel %vm4692_vm7, %v4644_v0, 0.0  ;;  %v6267_v27 = vld [vmem:[%s6882_s27 + $0x620] ss:$48 sps:$4 sm:$0xff]   ;;  %v6270_v30 = vld [vmem:[%s6882_s27 + $0x628] ss:$48 sps:$4 sm:$0xff]  }
 0x228   : > { %4740 = vst [vmem:[%s7419_s9 + $0x78] sm:$0xff] %v4716_v15  ;;  %4302 = vmatpush1.bf16.msra.mxu0 %v6249_v11  ;;  %4431 = vmatpush1.bf16.msra.mxu1 %v6252_v12  ;;  %v6275_v31 = vld [vmem:[%s6882_s27 + $0x684] ss:$48 sps:$4 sm:$0xff]   ;;  %v6278_v28 = vld [vmem:[%s6882_s27 + $0x68c] ss:$48 sps:$4 sm:$0xff]  }
 0x229   : > { %4303 = vmatprep.subr.bf16.mxu0 %v6257_v13  ;;  %4432 = vmatprep.subr.bf16.mxu1 %v6260_v14  ;;  %v6273_v32 = vld [vmem:[%s6882_s27 + $0x680] ss:$48 sps:$4 sm:$0xff]   ;;  %v6276_v33 = vld [vmem:[%s6882_s27 + $0x688] ss:$48 sps:$4 sm:$0xff]   ;;  %v6281_v29 = vld [vmem:[%s6882_s27 + $0x6e4] ss:$48 sps:$4 sm:$0xff]  }
 0x22a   : > { %v6284_v34 = vld [vmem:[%s6882_s27 + $0x6ec] ss:$48 sps:$4 sm:$0xff]   ;;  %v6282_v35 = vld [vmem:[%s6882_s27 + $0x6e8] ss:$48 sps:$4 sm:$0xff]   ;;  %v6287_v37 = vld [vmem:[%s6882_s27 + $0x744] ss:$48 sps:$4 sm:$0xff]  }
 0x22b   : > { %v6290_v38 = vld [vmem:[%s6882_s27 + $0x74c] ss:$48 sps:$4 sm:$0xff]   ;;  %v6285_v39 = vld [vmem:[%s6882_s27 + $0x740] ss:$48 sps:$4 sm:$0xff]   ;;  %v6288_v42 = vld [vmem:[%s6882_s27 + $0x748] ss:$48 sps:$4 sm:$0xff]  }
 0x22c   : > { %4304 = vmatpush1.bf16.msra.mxu0 %v6255_v16  ;;  %4433 = vmatpush1.bf16.msra.mxu1 %v6258_v18  ;;  %v6296_v40 = vld [vmem:[%s6882_s27 + $0x7ac] ss:$48 sps:$4 sm:$0xff]   ;;  %v6291_v41 = vld [vmem:[%s6882_s27 + $0x7a0] ss:$48 sps:$4 sm:$0xff]   ;;  %v6294_v43 = vld [vmem:[%s6882_s27 + $0x7a8] ss:$48 sps:$4 sm:$0xff]  }
 0x22d   : > { %4305 = vmatprep.subr.bf16.mxu0 %v6263_v19  ;;  %4434 = vmatprep.subr.bf16.mxu1 %v6266_v20  ;;  %v6299_v46 = vld [vmem:[%s6882_s27 + $0x804] ss:$48 sps:$4 sm:$0xff]   ;;  %v6302_v47 = vld [vmem:[%s6882_s27 + $0x80c] ss:$48 sps:$4 sm:$0xff]   ;;  %v6297_v48 = vld [vmem:[%s6882_s27 + $0x800] ss:$48 sps:$4 sm:$0xff]  }
 0x22e   : > { %v6300_v49 = vld [vmem:[%s6882_s27 + $0x808] ss:$48 sps:$4 sm:$0xff]   ;;  %v6305_v44 = vld [vmem:[%s6882_s27 + $0x864] ss:$48 sps:$4 sm:$0xff]   ;;  %v6308_v51 = vld [vmem:[%s6882_s27 + $0x86c] ss:$48 sps:$4 sm:$0xff]  }
 0x22f   : > { %v6303_v52 = vld [vmem:[%s6882_s27 + $0x860] ss:$48 sps:$4 sm:$0xff]   ;;  %v6306_v45 = vld [vmem:[%s6882_s27 + $0x868] ss:$48 sps:$4 sm:$0xff]   ;;  %v6311_v53 = vld [vmem:[%s6882_s27 + $0x8c4] ss:$48 sps:$4 sm:$0xff]  }
 0x230   : > { %4306 = vmatpush1.bf16.msra.mxu0 %v6261_v21  ;;  %4435 = vmatpush1.bf16.msra.mxu1 %v6264_v23  ;;  %v6314_v54 = vld [vmem:[%s6882_s27 + $0x8cc] ss:$48 sps:$4 sm:$0xff]   ;;  %v6309_v55 = vld [vmem:[%s6882_s27 + $0x8c0] ss:$48 sps:$4 sm:$0xff]   ;;  %v6312_v56 = vld [vmem:[%s6882_s27 + $0x8c8] ss:$48 sps:$4 sm:$0xff]  }
 0x231   : > { %4318 = vmatprep.subr.bf16.mxu0 %v6269_v24  ;;  %4447 = vmatprep.subr.bf16.mxu1 %v6272_v22  ;;  %v6317_v57 = vld [vmem:[%s6882_s27 + $0x924] ss:$48 sps:$4 sm:$0xff]   ;;  %v6320_v58 = vld [vmem:[%s6882_s27 + $0x92c] ss:$48 sps:$4 sm:$0xff]   ;;  %v6315_v59 = vld [vmem:[%s6882_s27 + $0x920] ss:$48 sps:$4 sm:$0xff]  }
 0x232   : > { %v6318_v50 = vld [vmem:[%s6882_s27 + $0x928] ss:$48 sps:$4 sm:$0xff]   ;;  %v6323_v61 = vld [vmem:[%s6882_s27 + $0x984] ss:$48 sps:$4 sm:$0xff]   ;;  %v6326_v62 = vld [vmem:[%s6882_s27 + $0x98c] ss:$48 sps:$4 sm:$0xff]  }
 0x233   : > { %4308 = vmatmul.mubr.bf16.vlgmr.msra.gmra.mrb[8].mxu0 %v6964_v9  ;;  %4437 = vmatmul.mubr.bf16.vlgmr.msra.gmra.mrb[8].mxu1 %v6964_v9  ;;  %v6279_v9 = vld [vmem:[%s6882_s27 + $0x6e0] ss:$48 sps:$4 sm:$0xff]   ;;  %v6324_v0 = vld [vmem:[%s6882_s27 + $0x988] ss:$48 sps:$4 sm:$0xff]   ;;  %v6329_v3 = vld [vmem:[%s6882_s27 + $0x9e4] ss:$48 sps:$4 sm:$0xff]  }
 0x234   : > { %4319 = vmatpush1.bf16.msra.mxu0 %v6267_v27  ;;  %4448 = vmatpush1.bf16.msra.mxu1 %v6270_v30  ;;  %v6321_v63 = vld [vmem:[%s6882_s27 + $0x980] ss:$48 sps:$4 sm:$0xff]   ;;  %v6332_v7 = vld [vmem:[%s6882_s27 + $0x9ec] ss:$48 sps:$4 sm:$0xff]   ;;  %v6330_v10 = vld [vmem:[%s6882_s27 + $0x9e8] ss:$48 sps:$4 sm:$0xff]  }
 0x235   : > { %4320 = vmatprep.subr.bf16.mxu0 %v6275_v31  ;;  %4449 = vmatprep.subr.bf16.mxu1 %v6278_v28  ;;  %v6327_v8 = vld [vmem:[%s6882_s27 + $0x9e0] ss:$48 sps:$4 sm:$0xff]   ;;  %v6335_v11 = vld [vmem:[%s6882_s27 + $0xa44] ss:$48 sps:$4 sm:$0xff]   ;;  %v6338_v12 = vld [vmem:[%s6882_s27 + $0xa4c] ss:$48 sps:$4 sm:$0xff]  }
 0x236   : > { %4350 = vmatprep.mubr.bf16.mxu0 %v6992_v36  ;;  %4479 = vmatprep.mubr.bf16.mxu1 %v6992_v36  ;;  %v6293_v36 = vld [vmem:[%s6882_s27 + $0x7a4] ss:$48 sps:$4 sm:$0xff]   ;;  %v6333_v13 = vld [vmem:[%s6882_s27 + $0xa40] ss:$48 sps:$4 sm:$0xff]   ;;  %v6336_v14 = vld [vmem:[%s6882_s27 + $0xa48] ss:$48 sps:$4 sm:$0xff]  }
 0x237   : > { %v6341_v15 = vld [vmem:[%s6882_s27 + $0xaa4] ss:$48 sps:$4 sm:$0xff]   ;;  %v6344_v16 = vld [vmem:[%s6882_s27 + $0xaac] ss:$48 sps:$4 sm:$0xff]   ;;  %v6339_v18 = vld [vmem:[%s6882_s27 + $0xaa0] ss:$48 sps:$4 sm:$0xff]  }
 0x238   : > { %4321 = vmatpush1.bf16.msra.mxu0 %v6273_v32  ;;  %4450 = vmatpush1.bf16.msra.mxu1 %v6276_v33  ;;  %v6342_v19 = vld [vmem:[%s6882_s27 + $0xaa8] ss:$48 sps:$4 sm:$0xff]   ;;  %v6347_v20 = vld [vmem:[%s6882_s27 + $0xb04] ss:$48 sps:$4 sm:$0xff]   ;;  %v6350_v21 = vld [vmem:[%s6882_s27 + $0xb0c] ss:$48 sps:$4 sm:$0xff]  }
 0x239   : > { %4322 = vmatprep.subr.bf16.mxu0 %v6281_v29  ;;  %4451 = vmatprep.subr.bf16.mxu1 %v6284_v34  ;;  %v6345_v23 = vld [vmem:[%s6882_s27 + $0xb00] ss:$48 sps:$4 sm:$0xff]   ;;  %v6348_v24 = vld [vmem:[%s6882_s27 + $0xb08] ss:$48 sps:$4 sm:$0xff]   ;;  %v6353_v22 = vld [vmem:[%s6882_s27 + $0xb64] ss:$48 sps:$4 sm:$0xff]  }
 0x23a   : > { %v6356_v27 = vld [vmem:[%s6882_s27 + $0xb6c] ss:$48 sps:$4 sm:$0xff]   ;;  %v6351_v30 = vld [vmem:[%s6882_s27 + $0xb60] ss:$48 sps:$4 sm:$0xff]   ;;  %v6354_v31 = vld [vmem:[%s6882_s27 + $0xb68] ss:$48 sps:$4 sm:$0xff]  }
 0x23b   : > { %v6359_v28 = vld [vmem:[%s6882_s27 + $0xbc4] ss:$48 sps:$4 sm:$0xff]   ;;  %v6362_v32 = vld [vmem:[%s6882_s27 + $0xbcc] ss:$48 sps:$4 sm:$0xff]   ;;  %v6357_v33 = vld [vmem:[%s6882_s27 + $0xbc0] ss:$48 sps:$4 sm:$0xff]  }
 0x23c   : > { %4323 = vmatpush1.bf16.msra.mxu0 %v6279_v9  ;;  %4452 = vmatpush1.bf16.msra.mxu1 %v6282_v35  ;;  %v6360_v29 = vld [vmem:[%s6882_s27 + $0xbc8] ss:$48 sps:$4 sm:$0xff]   ;;  %v6365_v34 = vld [vmem:[%s6882_s27 + $0xc24] ss:$48 sps:$4 sm:$0xff]   ;;  %v6368_v9 = vld [vmem:[%s6882_s27 + $0xc2c] ss:$48 sps:$4 sm:$0xff]  }
 0x23d   : > { %4324 = vmatprep.subr.bf16.mxu0 %v6287_v37  ;;  %4453 = vmatprep.subr.bf16.mxu1 %v6290_v38  ;;  %v6363_v35 = vld [vmem:[%s6882_s27 + $0xc20] ss:$48 sps:$4 sm:$0xff]   ;;  %v6366_v37 = vld [vmem:[%s6882_s27 + $0xc28] ss:$48 sps:$4 sm:$0xff]   ;;  %v6371_v38 = vld [vmem:[%s6882_s27 + $0xc84] ss:$48 sps:$4 sm:$0xff]  }
 0x240   : > { %4325 = vmatpush1.bf16.msra.mxu0 %v6285_v39  ;;  %4454 = vmatpush1.bf16.msra.mxu1 %v6288_v42  ;;  %v6374_v39 = vld [vmem:[%s6882_s27 + $0xc8c] ss:$48 sps:$4 sm:$0xff]   ;;  %v6369_v42 = vld [vmem:[%s6882_s27 + $0xc80] ss:$48 sps:$4 sm:$0xff]  }
 0x241   : > { %4326 = vmatprep.subr.bf16.mxu0 %v6293_v36  ;;  %4455 = vmatprep.subr.bf16.mxu1 %v6296_v40  ;;  %v6372_v36 = vld [vmem:[%s6882_s27 + $0xc88] ss:$48 sps:$4 sm:$0xff]   ;;  %v6377_v40 = vld [vmem:[%s6882_s27 + $0xce4] ss:$48 sps:$4 sm:$0xff]  }
 0x244   : > { %4327 = vmatpush1.bf16.msra.mxu0 %v6291_v41  ;;  %4456 = vmatpush1.bf16.msra.mxu1 %v6294_v43  ;;  %v6380_v41 = vld [vmem:[%s6882_s27 + $0xcec] ss:$48 sps:$4 sm:$0xff]   ;;  %v6378_v43 = vld [vmem:[%s6882_s27 + $0xce8] ss:$48 sps:$4 sm:$0xff]  }
 0x245   : > { %4328 = vmatprep.subr.bf16.mxu0 %v6299_v46  ;;  %4457 = vmatprep.subr.bf16.mxu1 %v6302_v47  ;;  %v6383_v46 = vld [vmem:[%s6882_s27 + $0xd44] ss:$48 sps:$4 sm:$0xff]   ;;  %v6386_v47 = vld [vmem:[%s6882_s27 + $0xd4c] ss:$48 sps:$4 sm:$0xff]  }
 0x248   : > { %4329 = vmatpush1.bf16.msra.mxu0 %v6297_v48  ;;  %4458 = vmatpush1.bf16.msra.mxu1 %v6300_v49  ;;  %v6381_v48 = vld [vmem:[%s6882_s27 + $0xd40] ss:$48 sps:$4 sm:$0xff]   ;;  %v6384_v49 = vld [vmem:[%s6882_s27 + $0xd48] ss:$48 sps:$4 sm:$0xff]  }
 0x249   : > { %4330 = vmatprep.subr.bf16.mxu0 %v6305_v44  ;;  %4459 = vmatprep.subr.bf16.mxu1 %v6308_v51  ;;  %v6392_v44 = vld [vmem:[%s6882_s27 + $0xdac] ss:$48 sps:$4 sm:$0xff]   ;;  %v6387_v51 = vld [vmem:[%s6882_s27 + $0xda0] ss:$48 sps:$4 sm:$0xff]  }
 0x24c   : > { %4331 = vmatpush1.bf16.msra.mxu0 %v6303_v52  ;;  %4460 = vmatpush1.bf16.msra.mxu1 %v6306_v45  ;;  %v6390_v52 = vld [vmem:[%s6882_s27 + $0xda8] ss:$48 sps:$4 sm:$0xff]   ;;  %v6395_v45 = vld [vmem:[%s6882_s27 + $0xe04] ss:$48 sps:$4 sm:$0xff]  }
 0x24d   : > { %4332 = vmatprep.subr.bf16.mxu0 %v6311_v53  ;;  %4461 = vmatprep.subr.bf16.mxu1 %v6314_v54  ;;  %v6398_v53 = vld [vmem:[%s6882_s27 + $0xe0c] ss:$48 sps:$4 sm:$0xff]   ;;  %v6393_v54 = vld [vmem:[%s6882_s27 + $0xe00] ss:$48 sps:$4 sm:$0xff]  }
 0x250   : > { %4333 = vmatpush1.bf16.msra.mxu0 %v6309_v55  ;;  %4462 = vmatpush1.bf16.msra.mxu1 %v6312_v56  ;;  %v6396_v55 = vld [vmem:[%s6882_s27 + $0xe08] ss:$48 sps:$4 sm:$0xff]   ;;  %v6401_v56 = vld [vmem:[%s6882_s27 + $0xe64] ss:$48 sps:$4 sm:$0xff]  }
 0x251   : > { %4334 = vmatprep.subr.bf16.mxu0 %v6317_v57  ;;  %4463 = vmatprep.subr.bf16.mxu1 %v6320_v58  ;;  %v6404_v57 = vld [vmem:[%s6882_s27 + $0xe6c] ss:$48 sps:$4 sm:$0xff]   ;;  %v6399_v58 = vld [vmem:[%s6882_s27 + $0xe60] ss:$48 sps:$4 sm:$0xff]  }
 0x254   : > { %4335 = vmatpush1.bf16.msra.mxu0 %v6315_v59  ;;  %4464 = vmatpush1.bf16.msra.mxu1 %v6318_v50  ;;  %v6402_v59 = vld [vmem:[%s6882_s27 + $0xe68] ss:$48 sps:$4 sm:$0xff]   ;;  %v6407_v50 = vld [vmem:[%s6882_s27 + $0xec4] ss:$48 sps:$4 sm:$0xff]  }
 0x255   : > { %4336 = vmatprep.subr.bf16.mxu0 %v6323_v61  ;;  %4465 = vmatprep.subr.bf16.mxu1 %v6326_v62  ;;  %v6410_v61 = vld [vmem:[%s6882_s27 + $0xecc] ss:$48 sps:$4 sm:$0xff]   ;;  %v6405_v62 = vld [vmem:[%s6882_s27 + $0xec0] ss:$48 sps:$4 sm:$0xff]  }
 0x258   : > { %4337 = vmatpush1.bf16.msra.mxu0 %v6321_v63  ;;  %4466 = vmatpush1.bf16.msra.mxu1 %v6324_v0  ;;  %v6408_v63 = vld [vmem:[%s6882_s27 + $0xec8] ss:$48 sps:$4 sm:$0xff]   ;;  %v6413_v0 = vld [vmem:[%s6882_s27 + $0xf24] ss:$48 sps:$4 sm:$0xff]  }
 0x259   : > { %4338 = vmatprep.subr.bf16.mxu0 %v6329_v3  ;;  %4467 = vmatprep.subr.bf16.mxu1 %v6332_v7  ;;  %v6416_v3 = vld [vmem:[%s6882_s27 + $0xf2c] ss:$48 sps:$4 sm:$0xff]   ;;  %v6411_v7 = vld [vmem:[%s6882_s27 + $0xf20] ss:$48 sps:$4 sm:$0xff]  }
 0x25c   : > { %4339 = vmatpush1.bf16.msra.mxu0 %v6327_v8  ;;  %4468 = vmatpush1.bf16.msra.mxu1 %v6330_v10  ;;  %v6414_v8 = vld [vmem:[%s6882_s27 + $0xf28] ss:$48 sps:$4 sm:$0xff]   ;;  %v6419_v10 = vld [vmem:[%s6882_s27 + $0xf84] ss:$48 sps:$4 sm:$0xff]  }
 0x25d   : > { %4340 = vmatprep.subr.bf16.mxu0 %v6335_v11  ;;  %4469 = vmatprep.subr.bf16.mxu1 %v6338_v12  ;;  %v6422_v11 = vld [vmem:[%s6882_s27 + $0xf8c] ss:$48 sps:$4 sm:$0xff]   ;;  %v6417_v12 = vld [vmem:[%s6882_s27 + $0xf80] ss:$48 sps:$4 sm:$0xff]  }
 0x260   : > { %4341 = vmatpush1.bf16.msra.mxu0 %v6333_v13  ;;  %4470 = vmatpush1.bf16.msra.mxu1 %v6336_v14  ;;  %v6420_v13 = vld [vmem:[%s6882_s27 + $0xf88] ss:$48 sps:$4 sm:$0xff]   ;;  %v6425_v14 = vld [vmem:[%s6882_s27 + $0xfe4] ss:$48 sps:$4 sm:$0xff]  }
 0x261   : > { %4342 = vmatprep.subr.bf16.mxu0 %v6341_v15  ;;  %4471 = vmatprep.subr.bf16.mxu1 %v6344_v16  ;;  %v6428_v15 = vld [vmem:[%s6882_s27 + $0xfec] ss:$48 sps:$4 sm:$0xff]   ;;  %v6423_v16 = vld [vmem:[%s6882_s27 + $0xfe0] ss:$48 sps:$4 sm:$0xff]  }
 0x264   : > { %4343 = vmatpush1.bf16.msra.mxu0 %v6339_v18  ;;  %4472 = vmatpush1.bf16.msra.mxu1 %v6342_v19  ;;  %v6426_v18 = vld [vmem:[%s6882_s27 + $0xfe8] ss:$48 sps:$4 sm:$0xff]   ;;  %v6431_v19 = vld [vmem:[%s6882_s27 + $0x1044] ss:$48 sps:$4 sm:$0xff]  }
 0x265   : > { %4344 = vmatprep.subr.bf16.mxu0 %v6347_v20  ;;  %4473 = vmatprep.subr.bf16.mxu1 %v6350_v21  ;;  %v6434_v20 = vld [vmem:[%s6882_s27 + $0x104c] ss:$48 sps:$4 sm:$0xff]   ;;  %v6429_v21 = vld [vmem:[%s6882_s27 + $0x1040] ss:$48 sps:$4 sm:$0xff]  }
 0x268   : > { %4345 = vmatpush1.bf16.msra.mxu0 %v6345_v23  ;;  %4474 = vmatpush1.bf16.msra.mxu1 %v6348_v24  ;;  %v6432_v23 = vld [vmem:[%s6882_s27 + $0x1048] ss:$48 sps:$4 sm:$0xff]   ;;  %v6437_v24 = vld [vmem:[%s6882_s27 + $0x10a4] ss:$48 sps:$4 sm:$0xff]  }
 0x269   : > { %4346 = vmatprep.subr.bf16.mxu0 %v6353_v22  ;;  %4475 = vmatprep.subr.bf16.mxu1 %v6356_v27  ;;  %v6440_v22 = vld [vmem:[%s6882_s27 + $0x10ac] ss:$48 sps:$4 sm:$0xff]   ;;  %v6435_v27 = vld [vmem:[%s6882_s27 + $0x10a0] ss:$48 sps:$4 sm:$0xff]  }
 0x26c   : > { %4347 = vmatpush1.bf16.msra.mxu0 %v6351_v30  ;;  %4476 = vmatpush1.bf16.msra.mxu1 %v6354_v31  ;;  %v6438_v30 = vld [vmem:[%s6882_s27 + $0x10a8] ss:$48 sps:$4 sm:$0xff]   ;;  %v6443_v31 = vld [vmem:[%s6882_s27 + $0x1104] ss:$48 sps:$4 sm:$0xff]  }
 0x26d   : > { %4348 = vmatprep.subr.bf16.mxu0 %v6359_v28  ;;  %4477 = vmatprep.subr.bf16.mxu1 %v6362_v32  ;;  %v6446_v28 = vld [vmem:[%s6882_s27 + $0x110c] ss:$48 sps:$4 sm:$0xff]   ;;  %v6441_v32 = vld [vmem:[%s6882_s27 + $0x1100] ss:$48 sps:$4 sm:$0xff]  }
 0x270   : > { %4349 = vmatpush1.bf16.msra.mxu0 %v6357_v33  ;;  %4478 = vmatpush1.bf16.msra.mxu1 %v6360_v29  ;;  %v6444_v33 = vld [vmem:[%s6882_s27 + $0x1108] ss:$48 sps:$4 sm:$0xff]   ;;  %v6449_v29 = vld [vmem:[%s6882_s27 + $0x1164] ss:$48 sps:$4 sm:$0xff]  }
 0x271   : > { %4361 = vmatprep.subr.bf16.mxu0 %v6365_v34  ;;  %4490 = vmatprep.subr.bf16.mxu1 %v6368_v9  ;;  %v6452_v34 = vld [vmem:[%s6882_s27 + $0x116c] ss:$48 sps:$4 sm:$0xff]   ;;  %v6447_v9 = vld [vmem:[%s6882_s27 + $0x1160] ss:$48 sps:$4 sm:$0xff]  }
 0x273   : > { %4351 = vmatmul.mubr.bf16.vlgmr.msra.gmra.mrb[8].mxu0 %v7036_v17  ;;  %4480 = vmatmul.mubr.bf16.vlgmr.msra.gmra.mrb[8].mxu1 %v7036_v17  ;;  %v6375_v17 = vld [vmem:[%s6882_s27 + $0xce0] ss:$48 sps:$4 sm:$0xff]  }
 0x274   : > { %4362 = vmatpush1.bf16.msra.mxu0 %v6363_v35  ;;  %4491 = vmatpush1.bf16.msra.mxu1 %v6366_v37  ;;  %v6450_v35 = vld [vmem:[%s6882_s27 + $0x1168] ss:$48 sps:$4 sm:$0xff]   ;;  %v6455_v37 = vld [vmem:[%s6882_s27 + $0x11c4] ss:$48 sps:$4 sm:$0xff]  }
 0x275   : > { %4363 = vmatprep.subr.bf16.mxu0 %v6371_v38  ;;  %4492 = vmatprep.subr.bf16.mxu1 %v6374_v39  ;;  %v6458_v38 = vld [vmem:[%s6882_s27 + $0x11cc] ss:$48 sps:$4 sm:$0xff]   ;;  %v6453_v39 = vld [vmem:[%s6882_s27 + $0x11c0] ss:$48 sps:$4 sm:$0xff]  }
 0x276   : > { %4393 = vmatprep.mubr.bf16.mxu0 %v7045_v25  ;;  %4522 = vmatprep.mubr.bf16.mxu1 %v7045_v25  ;;  %v6389_v25 = vld [vmem:[%s6882_s27 + $0xda4] ss:$48 sps:$4 sm:$0xff]  }
 0x278   : > { %4364 = vmatpush1.bf16.msra.mxu0 %v6369_v42  ;;  %4493 = vmatpush1.bf16.msra.mxu1 %v6372_v36  ;;  %v6456_v42 = vld [vmem:[%s6882_s27 + $0x11c8] ss:$48 sps:$4 sm:$0xff]   ;;  %v837_v36 = vsub.s32 4, %v7333_v60 }
 0x279   : > { %4365 = vmatprep.subr.bf16.mxu0 %v6377_v40  ;;  %4494 = vmatprep.subr.bf16.mxu1 %v6380_v41  ;;  %v845_v40 = vsub.s32 6, %v7333_v60  ;;  %v841_v41 = vsub.s32 5, %v7333_v60 }
 0x27c   : > { %4366 = vmatpush1.bf16.msra.mxu0 %v6375_v17  ;;  %4495 = vmatpush1.bf16.msra.mxu1 %v6378_v43  ;;  %v849_v17 = vsub.s32 7, %v7333_v60  ;;  %v838_v43 = vrot.slane %v7346_v4, %v837_v36 }
 0x27d   : > { %4367 = vmatprep.subr.bf16.mxu0 %v6383_v46  ;;  %4496 = vmatprep.subr.bf16.mxu1 %v6386_v47  ;;  %v846_v46 = vrot.slane %v7346_v4, %v845_v40  ;;  %v842_v47 = vrot.slane %v7346_v4, %v841_v41 }
 0x280   : > { %4368 = vmatpush1.bf16.msra.mxu0 %v6381_v48  ;;  %4497 = vmatpush1.bf16.msra.mxu1 %v6384_v49  ;;  %v850_v48 = vrot.slane %v7346_v4, %v849_v17 }
 0x281   : > { %4369 = vmatprep.subr.bf16.mxu0 %v6389_v25  ;;  %4498 = vmatprep.subr.bf16.mxu1 %v6392_v44 }
 0x284   : > { %4370 = vmatpush1.bf16.msra.mxu0 %v6387_v51  ;;  %4499 = vmatpush1.bf16.msra.mxu1 %v6390_v52 }
 0x285   : > { %4371 = vmatprep.subr.bf16.mxu0 %v6395_v45  ;;  %4500 = vmatprep.subr.bf16.mxu1 %v6398_v53 }
 0x288   : > { %4372 = vmatpush1.bf16.msra.mxu0 %v6393_v54  ;;  %4501 = vmatpush1.bf16.msra.mxu1 %v6396_v55 }
 0x289   : > { %4373 = vmatprep.subr.bf16.mxu0 %v6401_v56  ;;  %4502 = vmatprep.subr.bf16.mxu1 %v6404_v57 }
 0x28c   : > { %4374 = vmatpush1.bf16.msra.mxu0 %v6399_v58  ;;  %4503 = vmatpush1.bf16.msra.mxu1 %v6402_v59 }
 0x28d   : > { %4375 = vmatprep.subr.bf16.mxu0 %v6407_v50  ;;  %4504 = vmatprep.subr.bf16.mxu1 %v6410_v61 }
 0x290   : > { %4376 = vmatpush1.bf16.msra.mxu0 %v6405_v62  ;;  %4505 = vmatpush1.bf16.msra.mxu1 %v6408_v63 }
 0x291   : > { %4377 = vmatprep.subr.bf16.mxu0 %v6413_v0  ;;  %4506 = vmatprep.subr.bf16.mxu1 %v6416_v3 }
 0x294   : > { %4378 = vmatpush1.bf16.msra.mxu0 %v6411_v7  ;;  %4507 = vmatpush1.bf16.msra.mxu1 %v6414_v8 }
 0x295   : > { %4379 = vmatprep.subr.bf16.mxu0 %v6419_v10  ;;  %4508 = vmatprep.subr.bf16.mxu1 %v6422_v11 }
 0x298   : > { %4380 = vmatpush1.bf16.msra.mxu0 %v6417_v12  ;;  %4509 = vmatpush1.bf16.msra.mxu1 %v6420_v13 }
 0x299   : > { %4381 = vmatprep.subr.bf16.mxu0 %v6425_v14  ;;  %4510 = vmatprep.subr.bf16.mxu1 %v6428_v15 }
 0x29c   : > { %4382 = vmatpush1.bf16.msra.mxu0 %v6423_v16  ;;  %4511 = vmatpush1.bf16.msra.mxu1 %v6426_v18 }
 0x29d   : > { %4383 = vmatprep.subr.bf16.mxu0 %v6431_v19  ;;  %4512 = vmatprep.subr.bf16.mxu1 %v6434_v20 }
 0x2a0   : > { %4384 = vmatpush1.bf16.msra.mxu0 %v6429_v21  ;;  %4513 = vmatpush1.bf16.msra.mxu1 %v6432_v23 }
 0x2a1   : > { %4385 = vmatprep.subr.bf16.mxu0 %v6437_v24  ;;  %4514 = vmatprep.subr.bf16.mxu1 %v6440_v22 }
 0x2a4   : > { %4386 = vmatpush1.bf16.msra.mxu0 %v6435_v27  ;;  %4515 = vmatpush1.bf16.msra.mxu1 %v6438_v30 }
 0x2a5   : > { %4387 = vmatprep.subr.bf16.mxu0 %v6443_v31  ;;  %4516 = vmatprep.subr.bf16.mxu1 %v6446_v28 }
 0x2a8   : > { %4388 = vmatpush1.bf16.msra.mxu0 %v6441_v32  ;;  %4517 = vmatpush1.bf16.msra.mxu1 %v6444_v33 }
 0x2a9   : > { %4389 = vmatprep.subr.bf16.mxu0 %v6449_v29  ;;  %4518 = vmatprep.subr.bf16.mxu1 %v6452_v34 }
 0x2ac   : > { %4390 = vmatpush1.bf16.msra.mxu0 %v6447_v9  ;;  %4519 = vmatpush1.bf16.msra.mxu1 %v6450_v35 }
 0x2ad   : > { %4391 = vmatprep.subr.bf16.mxu0 %v6455_v37  ;;  %4520 = vmatprep.subr.bf16.mxu1 %v6458_v38 }
 0x2b0   : > { %4392 = vmatpush1.bf16.msra.mxu0 %v6453_v39  ;;  %4521 = vmatpush1.bf16.msra.mxu1 %v6456_v42 }
 0x2b3   : > { %4394 = vmatmul.mubr.bf16.vlgmr.msra.gmra.mrb[8].mxu0 %v7106_v26  ;;  %4523 = vmatmul.mubr.bf16.vlgmr.msra.gmra.mrb[8].mxu1 %v7106_v26 }
 0x2c6   : > { %v4137_v49 = vpop.f32.mrb[4].mxu0  ;;  %v4266_v25 = vpop.f32.mrb[4].mxu1 }
 0x2c7   : > { %v5455_v44 = vadd.f32 %v4137_v49, %v838_v43  ;;  %v5459_v26 = vadd.f32 %v4266_v25, %v846_v46  ;;  %v4139_v51 = vpop.f32.mrb[5].mxu0  ;;  %v4268_v52 = vpop.f32.mrb[5].mxu1 }
 0x2c8   : > { %v5456_v45 = vadd.f32 %v4139_v51, %v842_v47  ;;  %v5460_v53 = vadd.f32 %v4268_v52, %v850_v48  ;;  %v4141_v54 = vpop.f32.mrb[6].mxu0  ;;  %v4270_v55 = vpop.f32.mrb[6].mxu1 }
 0x2c9   : > { %v4561_v56 = vmul.f32 0.70710677, %v5455_v44  ;;  %v4563_v57 = vmul.f32 0.70710677, %v5459_v26  ;;  %v5457_v50 = vadd.f32 %v4141_v54, %v838_v43  ;;  %v5461_v61 = vadd.f32 %v4270_v55, %v846_v46  ;;  %v4143_v62 = vpop.f32.mrb[7].mxu0  ;;  %v4272_v63 = vpop.f32.mrb[7].mxu1 }
 0x2ca   : > { %v4562_v58 = vmul.f32 0.70710677, %v5456_v45  ;;  %v4564_v59 = vmul.f32 0.70710677, %v5460_v53  ;;  %v5458_v4 = vadd.f32 %v4143_v62, %v842_v47  ;;  %v5462_v0 = vadd.f32 %v4272_v63, %v850_v48 }
 0x2cb   : > { %6475 = verf.f32 %v4561_v56  ;;  %v4573_v3 = vmul.f32 0.70710677, %v5457_v50  ;;  %v4575_v7 = vmul.f32 0.70710677, %v5461_v61  ;;  %v4537_v13 = vmul.f32 0.5, %v5455_v44 }
 0x2cc   : > { %6477 = verf.f32 %v4563_v57  ;;  %v4574_v8 = vmul.f32 0.70710677, %v5458_v4  ;;  %v4576_v10 = vmul.f32 0.70710677, %v5462_v0  ;;  %v4539_v16 = vmul.f32 0.5, %v5459_v26 }
 0x2cd   : > { %6479 = verf.f32 %v4562_v58  ;;  %v4538_v21 = vmul.f32 0.5, %v5456_v45  ;;  %v4540_v24 = vmul.f32 0.5, %v5460_v53  ;;  %v4549_v31 = vmul.f32 0.5, %v5457_v50 }
 0x2ce   : > { %6481 = verf.f32 %v4564_v59  ;;  %v4551_v28 = vmul.f32 0.5, %v5461_v61  ;;  %v4550_v9 = vmul.f32 0.5, %v5458_v4  ;;  %v4552_v42 = vmul.f32 0.5, %v5462_v0  ;;  %v816_v59 = vld [vmem:[%s814_s11 + $0x8] sm:$0xf] }
 0x2cf   : > { %6483 = verf.f32 %v4573_v3  ;;  %v854_v50 = vrot.slane %v816_v59, %v821_v1  ;;  %v862_v61 = vrot.slane %v816_v59, %v829_v2  ;;  %v858_v62 = vrot.slane %v816_v59, %v825_v5 }
 0x2d0   : > { %6485 = verf.f32 %v4575_v7  ;;  %v866_v63 = vrot.slane %v816_v59, %v833_v6 }
 0x2d1   : > { %6487 = verf.f32 %v4574_v8 }
 0x2d2   : > { %6489 = verf.f32 %v4576_v10 }
 0x2d5   : > { %v6476_v11 = vpop.eup %6475 }
 0x2d6   : > { %v6478_v12 = vpop.eup %6477  ;;  %v4609_v14 = vadd.f32 1.0, %v6476_v11 }
 0x2d7   : > { %v6480_v15 = vpop.eup %6479  ;;  %v4611_v18 = vadd.f32 1.0, %v6478_v12 }
 0x2d8   : > { %v6482_v19 = vpop.eup %6481  ;;  %v4633_v20 = vmul.f32 %v4609_v14, %v4537_v13  ;;  %v4610_v23 = vadd.f32 1.0, %v6480_v15 }
 0x2d9   : > { %v6484_v22 = vpop.eup %6483  ;;  %v4635_v27 = vmul.f32 %v4611_v18, %v4539_v16  ;;  %v4612_v30 = vadd.f32 1.0, %v6482_v19 }
 0x2da   : > { %v6486_v32 = vpop.eup %6485  ;;  %v4657_v33 = vand.u32 2147483647, %v4633_v20  ;;  %v4634_v29 = vmul.f32 %v4610_v23, %v4538_v21  ;;  %v4621_v34 = vadd.f32 1.0, %v6484_v22 }
 0x2db   : > { %v6488_v35 = vpop.eup %6487  ;;  %v4659_v37 = vand.u32 2147483647, %v4635_v27  ;;  %v4636_v38 = vmul.f32 %v4612_v30, %v4540_v24  ;;  %v4623_v39 = vadd.f32 1.0, %v6486_v32 }
 0x2dc   : > { %v6490_v36 = vpop.eup %6489  ;;  %vm4681_vm8 = vcmp.gt.f32.partialorder %v4657_v33, 0.1  ;;  %v4658_v40 = vand.u32 2147483647, %v4634_v29  ;;  %v4645_v41 = vmul.f32 %v4621_v34, %v4549_v31  ;;  %v4622_v17 = vadd.f32 1.0, %v6488_v35 }
 0x2dd   : > { %v4705_v43 = vsel %vm4681_vm8, %v4633_v20, 0.0  ;;  %vm4683_vm9 = vcmp.gt.f32.partialorder %v4659_v37, 0.1  ;;  %v4660_v46 = vand.u32 2147483647, %v4636_v38  ;;  %v4647_v47 = vmul.f32 %v4623_v39, %v4551_v28 }
 0x2de   : > { %4729 = vst [vmem:[%s7419_s9 + $0x20] sm:$0xff] %v4705_v43  ;;  %v4707_v48 = vsel %vm4683_vm9, %v4635_v27, 0.0  ;;  %vm4682_vm10 = vcmp.gt.f32.partialorder %v4658_v40, 0.1  ;;  %v4669_v49 = vand.u32 2147483647, %v4645_v41  ;;  %v4646_v25 = vmul.f32 %v4622_v17, %v4550_v9 }
 0x2df   : > { %4731 = vst [vmem:[%s7419_s9 + $0x30] sm:$0xff] %v4707_v48  ;;  %v4706_v44 = vsel %vm4682_vm10, %v4634_v29, 0.0  ;;  %vm4684_vm11 = vcmp.gt.f32.partialorder %v4660_v46, 0.1  ;;  %v4671_v26 = vand.u32 2147483647, %v4647_v47 }
 0x2e0   : > { %v4624_v51 = vadd.f32 1.0, %v6490_v36  ;;  %4730 = vst [vmem:[%s7419_s9 + $0x28] sm:$0xff] %v4706_v44  ;;  %v4708_v52 = vsel %vm4684_vm11, %v4636_v38, 0.0  ;;  %vm4693_vm12 = vcmp.gt.f32.partialorder %v4669_v49, 0.1 }
 0x2e1   : > { %v4670_v45 = vand.u32 2147483647, %v4646_v25  ;;  %4732 = vst [vmem:[%s7419_s9 + $0x38] sm:$0xff] %v4708_v52  ;;  %v4717_v53 = vsel %vm4693_vm12, %v4645_v41, 0.0  ;;  %vm4695_vm13 = vcmp.gt.f32.partialorder %v4671_v26, 0.1 }
 0x2e2   : > { %v4648_v54 = vmul.f32 %v4624_v51, %v4552_v42  ;;  %4741 = vst [vmem:[%s7419_s9 + $0x80] sm:$0xff] %v4717_v53  ;;  %v4719_v55 = vsel %vm4695_vm13, %v4647_v47, 0.0 }
 0x2e3   : > { %vm4694_vm14 = vcmp.gt.f32.partialorder %v4670_v45, 0.1  ;;  %4743 = vst [vmem:[%s7419_s9 + $0x90] sm:$0xff] %v4719_v55 }
 0x2e4   : > { %v4718_v56 = vsel %vm4694_vm14, %v4646_v25, 0.0  ;;  %v4672_v57 = vand.u32 2147483647, %v4648_v54 }
 0x2e5   : > { %4742 = vst [vmem:[%s7419_s9 + $0x88] sm:$0xff] %v4718_v56 }
 0x2e6   : > { %vm4696_vm15 = vcmp.gt.f32.partialorder %v4672_v57, 0.1 }
 0x2e7   : > { %v4720_v58 = vsel %vm4696_vm15, %v4648_v54, 0.0 }
 0x2e8   : > { %4744 = vst [vmem:[%s7419_s9 + $0x98] sm:$0xff] %v4720_v58 }
 0x386   : > { %v4395_v4 = vpop.f32.mrb[8].mxu0  ;;  %v4524_v0 = vpop.f32.mrb[8].mxu1 }
 0x387   : > { %v5463_v3 = vadd.f32 %v4395_v4, %v854_v50  ;;  %v5467_v7 = vadd.f32 %v4524_v0, %v862_v61  ;;  %v4397_v8 = vpop.f32.mrb[9].mxu0  ;;  %v4526_v10 = vpop.f32.mrb[9].mxu1 }
 0x388   : > { %v5464_v11 = vadd.f32 %v4397_v8, %v858_v62  ;;  %v5468_v12 = vadd.f32 %v4526_v10, %v866_v63  ;;  %v4399_v13 = vpop.f32.mrb[10].mxu0  ;;  %v4528_v14 = vpop.f32.mrb[10].mxu1 }
 0x389   : > { %v4565_v1 = vmul.f32 0.70710677, %v5463_v3  ;;  %v4567_v15 = vmul.f32 0.70710677, %v5467_v7  ;;  %v5465_v18 = vadd.f32 %v4399_v13, %v854_v50  ;;  %v5469_v5 = vadd.f32 %v4528_v14, %v862_v61  ;;  %v4401_v19 = vpop.f32.mrb[11].mxu0  ;;  %v4530_v60 = vpop.f32.mrb[11].mxu1 }
 0x38a   : > { %v4566_v16 = vmul.f32 0.70710677, %v5464_v11  ;;  %v4568_v2 = vmul.f32 0.70710677, %v5468_v12  ;;  %v5466_v6 = vadd.f32 %v4401_v19, %v858_v62  ;;  %v5470_v20 = vadd.f32 %v4530_v60, %v866_v63 }
 0x38b   : > { %6491 = verf.f32 %v4565_v1  ;;  %v4577_v21 = vmul.f32 0.70710677, %v5465_v18  ;;  %v4579_v23 = vmul.f32 0.70710677, %v5469_v5  ;;  %v4541_v31 = vmul.f32 0.5, %v5463_v3 }
 0x38c   : > { %6493 = verf.f32 %v4567_v15  ;;  %v4578_v24 = vmul.f32 0.70710677, %v5466_v6  ;;  %v4580_v22 = vmul.f32 0.70710677, %v5470_v20  ;;  %v4543_v33 = vmul.f32 0.5, %v5467_v7 }
 0x38d   : > { %6495 = verf.f32 %v4566_v16  ;;  %v4542_v35 = vmul.f32 0.5, %v5464_v11  ;;  %v4544_v38 = vmul.f32 0.5, %v5468_v12  ;;  %v4553_v40 = vmul.f32 0.5, %v5465_v18 }
 0x38e   : > { %6497 = verf.f32 %v4568_v2  ;;  %v4555_v41 = vmul.f32 0.5, %v5469_v5  ;;  %v4554_v48 = vmul.f32 0.5, %v5466_v6  ;;  %v4556_v51 = vmul.f32 0.5, %v5470_v20 }
 0x38f   : > { %6499 = verf.f32 %v4577_v21 }
 0x390   : > { %6501 = verf.f32 %v4579_v23 }
 0x391   : > { %6503 = verf.f32 %v4578_v24 }
 0x392   : > { %6505 = verf.f32 %v4580_v22 }
 0x395   : > { %v6492_v27 = vpop.eup %6491 }
 0x396   : > { %v6494_v30 = vpop.eup %6493  ;;  %v4613_v28 = vadd.f32 1.0, %v6492_v27 }
 0x397   : > { %v6496_v32 = vpop.eup %6495  ;;  %v4615_v29 = vadd.f32 1.0, %v6494_v30 }
 0x398   : > { %v6498_v34 = vpop.eup %6497  ;;  %v4637_v9 = vmul.f32 %v4613_v28, %v4541_v31  ;;  %v4614_v37 = vadd.f32 1.0, %v6496_v32 }
 0x399   : > { %v6500_v39 = vpop.eup %6499  ;;  %v4639_v42 = vmul.f32 %v4615_v29, %v4543_v33  ;;  %v4616_v36 = vadd.f32 1.0, %v6498_v34 }
 0x39a   : > { %v6502_v17 = vpop.eup %6501  ;;  %v4661_v43 = vand.u32 2147483647, %v4637_v9  ;;  %v4638_v46 = vmul.f32 %v4614_v37, %v4542_v35  ;;  %v4625_v47 = vadd.f32 1.0, %v6500_v39 }
 0x39b   : > { %v6504_v49 = vpop.eup %6503  ;;  %v4663_v25 = vand.u32 2147483647, %v4639_v42  ;;  %v4640_v44 = vmul.f32 %v4616_v36, %v4544_v38  ;;  %v4627_v26 = vadd.f32 1.0, %v6502_v17 }
 0x39c   : > { %v6506_v52 = vpop.eup %6505  ;;  %vm4685_vm0 = vcmp.gt.f32.partialorder %v4661_v43, 0.1  ;;  %v4662_v45 = vand.u32 2147483647, %v4638_v46  ;;  %v4649_v53 = vmul.f32 %v4625_v47, %v4553_v40  ;;  %v4626_v54 = vadd.f32 1.0, %v6504_v49 }
 0x39d   : > { %v4709_v55 = vsel %vm4685_vm0, %v4637_v9, 0.0  ;;  %vm4687_vm1 = vcmp.gt.f32.partialorder %v4663_v25, 0.1  ;;  %v4664_v56 = vand.u32 2147483647, %v4640_v44  ;;  %v4651_v57 = vmul.f32 %v4627_v26, %v4555_v41 }
 0x39e   : > { %4733 = vst [vmem:[%s7419_s9 + $0x40] sm:$0xff] %v4709_v55  ;;  %v4711_v58 = vsel %vm4687_vm1, %v4639_v42, 0.0  ;;  %vm4686_vm2 = vcmp.gt.f32.partialorder %v4662_v45, 0.1  ;;  %v4673_v59 = vand.u32 2147483647, %v4649_v53  ;;  %v4650_v50 = vmul.f32 %v4626_v54, %v4554_v48 }
 0x39f   : > { %4735 = vst [vmem:[%s7419_s9 + $0x50] sm:$0xff] %v4711_v58  ;;  %v4710_v61 = vsel %vm4686_vm2, %v4638_v46, 0.0  ;;  %vm4688_vm3 = vcmp.gt.f32.partialorder %v4664_v56, 0.1  ;;  %v4675_v62 = vand.u32 2147483647, %v4651_v57 }
 0x3a0   : > { %v4628_v63 = vadd.f32 1.0, %v6506_v52  ;;  %4734 = vst [vmem:[%s7419_s9 + $0x48] sm:$0xff] %v4710_v61  ;;  %v4712_v4 = vsel %vm4688_vm3, %v4640_v44, 0.0  ;;  %vm4697_vm4 = vcmp.gt.f32.partialorder %v4673_v59, 0.1 }
 0x3a1   : > { %v4674_v0 = vand.u32 2147483647, %v4650_v50  ;;  %4736 = vst [vmem:[%s7419_s9 + $0x58] sm:$0xff] %v4712_v4  ;;  %v4721_v3 = vsel %vm4697_vm4, %v4649_v53, 0.0  ;;  %vm4699_vm5 = vcmp.gt.f32.partialorder %v4675_v62, 0.1 }
 0x3a2   : > { %v4652_v7 = vmul.f32 %v4628_v63, %v4556_v51  ;;  %4745 = vst [vmem:[%s7419_s9 + $0xa0] sm:$0xff] %v4721_v3  ;;  %v4723_v8 = vsel %vm4699_vm5, %v4651_v57, 0.0 }
 0x3a3   : > { %vm4698_vm6 = vcmp.gt.f32.partialorder %v4674_v0, 0.1  ;;  %4747 = vst [vmem:[%s7419_s9 + $0xb0] sm:$0xff] %v4723_v8 }
 0x3a4   : > { %v4722_v10 = vsel %vm4698_vm6, %v4650_v50, 0.0  ;;  %v4676_v11 = vand.u32 2147483647, %v4652_v7 }
 0x3a5   : > { %4746 = vst [vmem:[%s7419_s9 + $0xa8] sm:$0xff] %v4722_v10 }
 0x3a6   : > { %vm4700_vm7 = vcmp.gt.f32.partialorder %v4676_v11, 0.1 }
 0x3a7   : > { %v4724_v12 = vsel %vm4700_vm7, %v4652_v7, 0.0 }
 0x3a8   : > { %4748 = vst [vmem:[%s7419_s9 + $0xb8] sm:$0xff] %v4724_v12 }
 0x3a9   : > { %6606 = shalt.err (!%p6603_p13)
}
 0x3aa   : > { %s6607_s30 = scalar_lea.hbm %s7618_s7, 3072  ;;  %s6611_s27 = scalar_lea.hbm %s7670_s3, 6144 }
 0x3ab   : > { %p6608_p1 = scmp.ne.s32.totalorder %s7618_s7, %s6607_s30  ;;  %p6612_p9 = scmp.lt.u32.totalorder %s7618_s7, %s7670_s3 }
 0x3ac   : > { %p6613_p8 = scmp.lt.u32.totalorder %s6611_s27, %s6607_s30  ;;  %p6615_p5 = scmp.lt.u32.totalorder %s6607_s30, %s7618_s7 }
 0x3ad   : > { %p6609_p11 = pnand %p6608_p1, %p7691_p10 }
 0x3ae   : > { %p6614_p4 = por %p6613_p8, %p6612_p9 }
 0x3af   : > { %p6610_p3 = pneg %p6609_p11 }
 0x3b0   : > { %p6616_p2 = por %p6615_p5, %p6614_p4 }
 0x3b2   : > { %p6617_p0 = pnand %p6616_p2, %p6610_p3 }
 0x3b4   : > { %6620 = shalt.err (!%p6617_p0)
}
 0x3b5   : > { %s6675_s11 = smov 1536   ;;  %s6676_s17 = smov 3072  }
 0x3b6   : > { %s6677_s9 = smov 96  }
 0x3b7   : > { %5533 = dma.vmem_to_hbm [thread:$0]  (%p7691_p10), %s7622_s10, 3072, %s7618_s7, %s4750_s22, %s6675_s11, %s6676_s17, %s6677_s9  }
 0x3b8 PF: > { %s4778_s28 = sand.u32 1, %s6655_s12   ;;  %p7692_p7 = scmp.ne.s32.totalorder %s7679_s25, 0 }
 0x3b9   : > { %p7693_p6 = scmp.ge.s32.totalorder %s6667_s15, 2  ;;  %s4779_s6 = scalar_lea.sflag [#allocation4], %s4778_s28 }
 0x3bb   : > { %p5547_p12 = pnand %p7693_p6, %p7692_p7 }
 0x3bd   : > { %6650 = dma.done.wait (!%p5547_p12), %s4779_s6, 3072  }
 0x3be   : > { %6652 = vsyncadd (!%p5547_p12), %s4779_s6, 4294964224  ;;  %p17_p13 = scmp.ge.s32.totalorder %s6723_s18, 4   ;;  %s7694_s12 = smov %s6659_s13 }
 0x3bf   : > { %s7695_s13 = smov %s6663_s14  ;;  %s7696_s14 = smov %s6735_s21 }
 0x3c0   : > { %s7697_s15 = smov %s6723_s18  ;;  %19 = sbr.rel (!%p17_p13) target bundleno = 6 (0x6), region = 87 }
 0x3c7   :  { %4784 = vsyncpa [#allocation3], 1 }
 0x3c8   :  { %4786 = vsyncpa [#allocation3 + $0x1], 1 }
 0x3c9   :  { %4787 = vsyncpa [#allocation6], 1 }
 0x3ca   :  { %4789 = vsyncpa [#allocation6 + $0x1], 1 }
 0x3cb   :  { %4790 = vsyncpa [#allocation4], 1 }
 0x3cc   :  { %4792 = vsyncpa [#allocation4 + $0x1], 1 }

</bundles_post_ra>
